<compile_context>
chip_gen: v7x
topology: tpu7x:2x2x1
jax: 0.10.0
libtpu: 0.0.40
codegen_flags: <defaults>
</compile_context>

<pallas_src>
import functools

import jax
import jax.numpy as jnp
import numpy as np
from jax import lax
from jax.experimental import pallas as pl
from jax.experimental.pallas import tpu as pltpu


def _sigmoid(x):
    # Single EUP push (tanh); jax.nn.sigmoid may lower to exp + reciprocal.
    return 0.5 * jnp.tanh(0.5 * x) + 0.5


def dqn_gru_kernel(x_ref,        # (S*Bp, E) bf16, time-major rows, batch padded to Bp
                   wih_ref,      # (E, 6H)   bf16, cols [rz_f | rz_b | n_f | n_b]
                   bproj_ref,    # (1, 6H)   f32,  b_ih (+ b_hh for r,z) folded, same layout
                   whh_f_ref,    # (H, 3H)   bf16, cols [r | z | n]
                   whh_b_ref,    # (H, 3H)   bf16
                   bhhn_f_ref,   # (1, H)    f32   b_hh of the n gate, fwd
                   bhhn_b_ref,   # (1, H)    f32   b_hh of the n gate, bwd
                   wout_b_ref,   # (H, A)    bf16  head rows for h_bwd
                   wout_f_ref,   # (H, A)    bf16  head rows for h_fwd
                   bout_ref,     # (1, A)    f32
                   out_ref,      # (Bp, A)   f32
                   *, seq_len, batch_pad):
    S, Bp = seq_len, batch_pad
    H = whh_f_ref.shape[0]

    # ---- hoisted input projection: one MXU matmul for all timesteps, both
    # directions, all gates; bf16 operands, f32 accumulation. ----
    gi = jnp.dot(x_ref[...], wih_ref[...],
                 preferred_element_type=jnp.float32) + bproj_ref[...]   # (S*Bp, 6H)

    # One-time column splits (off the recurrent chain).  With H=32 the layout
    # [rz_f | rz_b | n_f | n_b] keeps every slice inside one 128-lane tile.
    gi_rz_f = gi[:, 0:2 * H]
    gi_rz_b = gi[:, 2 * H:4 * H]
    gi_n_f = gi[:, 4 * H:5 * H]
    gi_n_b = gi[:, 5 * H:6 * H]

    whh_f = whh_f_ref[...]
    whh_b = whh_b_ref[...]
    # Hoisted bias broadcasts (JAX does not CSE broadcast_in_dim in an
    # unrolled loop; these sit inside r*(...) on the serial chain otherwise).
    bn_f = jnp.broadcast_to(bhhn_f_ref[...], (Bp, H))
    bn_b = jnp.broadcast_to(bhhn_b_ref[...], (Bp, H))

    def cell(i_rz, i_n, h, whh, b_n):
        # torch.nn.GRU cell, gate order (r, z, n); b_ih (+ b_hh for r,z)
        # already folded into i_*.  All three hidden-gate matmuls fused into
        # ONE (Bp,H)x(H,3H) bf16 MXU push; r & z share one EUP sigmoid.
        gh = jnp.dot(h.astype(jnp.bfloat16), whh,
                     preferred_element_type=jnp.float32)         # (Bp, 3H)
        rz = _sigmoid(i_rz + gh[:, 0:2 * H])                     # 1 EUP push
        r, z = rz[:, 0:H], rz[:, H:2 * H]
        n = jnp.tanh(i_n + r * (gh[:, 2 * H:3 * H] + b_n))       # 1 EUP push
        return (1.0 - z) * n + z * h

    h_f = jnp.zeros((Bp, H), jnp.float32)
    h_b = jnp.zeros((Bp, H), jnp.float32)

    # Fused forward/backward recurrence, fully unrolled (S static & small);
    # the two independent per-direction chains interleave in the scheduler.
    for t in range(S):
        rf = slice(t * Bp, (t + 1) * Bp)                 # time t      (forward)
        rb = slice((S - 1 - t) * Bp, (S - t) * Bp)       # time S-1-t  (backward)
        h_f = cell(gi_rz_f[rf], gi_n_f[rf], h_f, whh_f, bn_f)
        h_b = cell(gi_rz_b[rb], gi_n_b[rb], h_b, whh_b, bn_b)

    # final_hidden = cat(h_bwd, h_fwd); split head matmul avoids the lane concat.
    out_ref[...] = (jnp.dot(h_b.astype(jnp.bfloat16), wout_b_ref[...],
                            preferred_element_type=jnp.float32)
                    + jnp.dot(h_f.astype(jnp.bfloat16), wout_f_ref[...],
                              preferred_element_type=jnp.float32)
                    + bout_ref[...])


def dqn_gru_forward(x_bse, params):
    """x_bse: (B, S, 768) float32 embedding (what bert_embedding would return)."""
    B, S, E = x_bse.shape
    H = params["whh_f"].shape[0]
    A = params["wout"].shape[1]
    Bp = ((B + 7) // 8) * 8          # pad batch to the sublane tile (8)

    # ---- one-time parameter/layout prep (pure data movement, no compute) ----
    def cat_gate_cols(wf, wb):
        # column layout [rz_f | rz_b | n_f | n_b]
        return jnp.concatenate(
            [wf[:, :2 * H], wb[:, :2 * H], wf[:, 2 * H:], wb[:, 2 * H:]], axis=1)

    wih_cat = cat_gate_cols(params["wih_f"], params["wih_b"]).astype(jnp.bfloat16)  # (E, 6H)

    # b_ih + b_hh for the r,z gates; b_ih only for the n gate (its b_hh stays
    # inside r * (...) in the cell).
    bproj = jnp.concatenate(
        [params["bih_f"][:, :2 * H] + params["bhh_f"][:, :2 * H],
         params["bih_b"][:, :2 * H] + params["bhh_b"][:, :2 * H],
         params["bih_f"][:, 2 * H:],
         params["bih_b"][:, 2 * H:]], axis=1)                                        # (1, 6H)
    bhhn_f = params["bhh_f"][:, 2 * H:]                                              # (1, H)
    bhhn_b = params["bhh_b"][:, 2 * H:]                                              # (1, H)

    whh_f = params["whh_f"].astype(jnp.bfloat16)                                     # (H, 3H)
    whh_b = params["whh_b"].astype(jnp.bfloat16)
    # Head split so the kernel never lane-concatenates h_bwd/h_fwd; MyGRU's
    # final_hidden order is (backward, forward) -> rows [:H] / [H:].
    wout_b = params["wout"][:H].astype(jnp.bfloat16)
    wout_f = params["wout"][H:].astype(jnp.bfloat16)

    # Time-major, batch padded to Bp, flattened to (S*Bp, E) so the projection
    # is one matmul and every per-step row slice is sublane-tile aligned.
    # TODO(synk): at real shapes fold pad/transpose into BlockSpec streaming.
    x_pad = x_bse if Bp == B else jnp.pad(x_bse, ((0, Bp - B), (0, 0), (0, 0)))
    x2d = jnp.transpose(x_pad, (1, 0, 2)).reshape(S * Bp, E).astype(jnp.bfloat16)

    vmem = pl.BlockSpec(memory_space=pltpu.MemorySpace.VMEM)
    args = (x2d, wih_cat, bproj, whh_f, whh_b, bhhn_f, bhhn_b,
            wout_b, wout_f, params["bout"])

    out = pl.pallas_call(
        functools.partial(dqn_gru_kernel, seq_len=S, batch_pad=Bp),
        out_shape=jax.ShapeDtypeStruct((Bp, A), jnp.float32),
        in_specs=[vmem] * len(args),
        out_specs=vmem,
    )(*args)
    return out[:B]


def reference_forward(x_bse, params):
    """Pure-JAX reference with torch.nn.GRU semantics.

    Mirrors the kernel's intentional precision choice (bf16 matmul operands,
    f32 accumulation) but uses the plain per-step / per-gate formulation and
    torch's native gate layout, so it independently validates the kernel's
    layout plumbing, bias folding and bidirectional final-state handling."""
    H = params["whh_f"].shape[0]
    B, S, _ = x_bse.shape

    def mm(a, b):
        return jnp.dot(a.astype(jnp.bfloat16), b.astype(jnp.bfloat16),
                       preferred_element_type=jnp.float32)

    def cell(x_t, h, wih, whh, bih, bhh):
        gi = mm(x_t, wih) + bih
        gh = mm(h, whh)
        r = jax.nn.sigmoid(gi[:, :H] + gh[:, :H] + bhh[:, :H])
        z = jax.nn.sigmoid(gi[:, H:2 * H] + gh[:, H:2 * H] + bhh[:, H:2 * H])
        n = jnp.tanh(gi[:, 2 * H:] + r * (gh[:, 2 * H:] + bhh[:, 2 * H:]))
        return (1.0 - z) * n + z * h

    h_f = jnp.zeros((B, H), jnp.float32)
    h_b = jnp.zeros((B, H), jnp.float32)
    for t in range(S):
        h_f = cell(x_bse[:, t, :], h_f, params["wih_f"], params["whh_f"],
                   params["bih_f"], params["bhh_f"])
        h_b = cell(x_bse[:, S - 1 - t, :], h_b, params["wih_b"], params["whh_b"],
                   params["bih_b"], params["bhh_b"])
    final_hidden = jnp.concatenate([h_b, h_f], axis=1)     # (backward, forward), as in MyGRU
    return mm(final_hidden, params["wout"]) + params["bout"]


def init_params(key, emb, hidden, action_dim):
    k = 1.0 / np.sqrt(hidden)
    ks = jax.random.split(key, 10)

    def u(kk, shape):
        return jax.random.uniform(kk, shape, jnp.float32, minval=-k, maxval=k)

    return {
        # forward direction (weights stored transposed vs torch: W^T, gate order r,z,n)
        "wih_f": u(ks[0], (emb, 3 * hidden)),
        "whh_f": u(ks[1], (hidden, 3 * hidden)),
        "bih_f": u(ks[2], (1, 3 * hidden)),
        "bhh_f": u(ks[3], (1, 3 * hidden)),
        # backward direction
        "wih_b": u(ks[4], (emb, 3 * hidden)),
        "whh_b": u(ks[5], (hidden, 3 * hidden)),
        "bih_b": u(ks[6], (1, 3 * hidden)),
        "bhh_b": u(ks[7], (1, 3 * hidden)),
        # final_layer: Linear(2*hidden, action_dim), rows ordered (backward, forward)
        "wout": u(ks[8], (2 * hidden, action_dim)),
        "bout": u(ks[9], (1, action_dim)),
    }


if __name__ == "__main__":
    B, S, E = 2, 8, 768          # batch, seq (stand-in for max_length), BERT emb size
    H, A = 32, 4                 # hidden_dim, action_dim = prod(action_shape)

    key = jax.random.PRNGKey(0)
    kx, kp = jax.random.split(key)
    x = jax.random.normal(kx, (B, S, E), jnp.float32)   # synthetic "bert_embedding" output
    params = init_params(kp, E, H, A)

    out = jax.block_until_ready(dqn_gru_forward(x, params))
    ref = jax.block_until_ready(reference_forward(x, params))

    assert out.shape == (B, A)
    np.testing.assert_allclose(np.asarray(out), np.asarray(ref), rtol=1e-2, atol=1e-2)
    print("KERNEL_OK")
</pallas_src>

<mosaic_0001>
module attributes {stable_mosaic.version = 11 : i64} {
  func.func @dqn_gru_kernel(%arg0: memref<64x768xbf16, #tpu.memory_space<vmem>>, %arg1: memref<768x192xbf16, #tpu.memory_space<vmem>>, %arg2: memref<1x192xf32, #tpu.memory_space<vmem>>, %arg3: memref<32x96xbf16, #tpu.memory_space<vmem>>, %arg4: memref<32x96xbf16, #tpu.memory_space<vmem>>, %arg5: memref<1x32xf32, #tpu.memory_space<vmem>>, %arg6: memref<1x32xf32, #tpu.memory_space<vmem>>, %arg7: memref<32x4xbf16, #tpu.memory_space<vmem>>, %arg8: memref<32x4xbf16, #tpu.memory_space<vmem>>, %arg9: memref<1x4xf32, #tpu.memory_space<vmem>>, %arg10: memref<8x4xf32, #tpu.memory_space<vmem>>) attributes {dimension_semantics = [], scalar_prefetch = 0 : i64, scratch_operands = 0 : i64, tpu.core_type = #tpu.core_type<tc>} {
    %c0 = arith.constant 0 : index
    %c0_0 = arith.constant 0 : index
    %0 = vector.load %arg0[%c0, %c0_0] : memref<64x768xbf16, #tpu.memory_space<vmem>>, vector<64x768xbf16>
    %c0_1 = arith.constant 0 : index
    %c0_2 = arith.constant 0 : index
    %1 = vector.load %arg1[%c0_1, %c0_2] : memref<768x192xbf16, #tpu.memory_space<vmem>>, vector<768x192xbf16>
    %cst = arith.constant dense<0.000000e+00> : vector<64x192xf32>
    %2 = tpu.matmul %0, %1, %cst {dimension_numbers = #tpu.dot_dimension_numbers<[1], [0], [0], [1], [0, 0, 1, 1], [], []>} : vector<64x768xbf16>, vector<768x192xbf16>, vector<64x192xf32> -> vector<64x192xf32>
    %c0_3 = arith.constant 0 : index
    %c0_4 = arith.constant 0 : index
    %3 = vector.load %arg2[%c0_3, %c0_4] : memref<1x192xf32, #tpu.memory_space<vmem>>, vector<1x192xf32>
    %4 = vector.broadcast %3 : vector<1x192xf32> to vector<64x192xf32>
    %5 = arith.addf %2, %4 : vector<64x192xf32>
    %6 = vector.extract_strided_slice %5 {offsets = [0, 0], sizes = [64, 64], strides = [1, 1]} : vector<64x192xf32> to vector<64x64xf32>
    %7 = vector.extract_strided_slice %5 {offsets = [0, 64], sizes = [64, 64], strides = [1, 1]} : vector<64x192xf32> to vector<64x64xf32>
    %8 = vector.extract_strided_slice %5 {offsets = [0, 128], sizes = [64, 32], strides = [1, 1]} : vector<64x192xf32> to vector<64x32xf32>
    %9 = vector.extract_strided_slice %5 {offsets = [0, 160], sizes = [64, 32], strides = [1, 1]} : vector<64x192xf32> to vector<64x32xf32>
    %c0_5 = arith.constant 0 : index
    %c0_6 = arith.constant 0 : index
    %10 = vector.load %arg3[%c0_5, %c0_6] : memref<32x96xbf16, #tpu.memory_space<vmem>>, vector<32x96xbf16>
    %c0_7 = arith.constant 0 : index
    %c0_8 = arith.constant 0 : index
    %11 = vector.load %arg4[%c0_7, %c0_8] : memref<32x96xbf16, #tpu.memory_space<vmem>>, vector<32x96xbf16>
    %c0_9 = arith.constant 0 : index
    %c0_10 = arith.constant 0 : index
    %12 = vector.load %arg5[%c0_9, %c0_10] : memref<1x32xf32, #tpu.memory_space<vmem>>, vector<1x32xf32>
    %13 = vector.shape_cast %12 : vector<1x32xf32> to vector<1x32xf32>
    %14 = vector.broadcast %13 : vector<1x32xf32> to vector<8x32xf32>
    %c0_11 = arith.constant 0 : index
    %c0_12 = arith.constant 0 : index
    %15 = vector.load %arg6[%c0_11, %c0_12] : memref<1x32xf32, #tpu.memory_space<vmem>>, vector<1x32xf32>
    %16 = vector.shape_cast %15 : vector<1x32xf32> to vector<1x32xf32>
    %17 = vector.broadcast %16 : vector<1x32xf32> to vector<8x32xf32>
    %cst_13 = arith.constant 0.000000e+00 : f32
    %18 = vector.broadcast %cst_13 : f32 to vector<8x32xf32>
    %cst_14 = arith.constant 0.000000e+00 : f32
    %19 = vector.broadcast %cst_14 : f32 to vector<8x32xf32>
    %20 = vector.extract_strided_slice %6 {offsets = [0, 0], sizes = [8, 64], strides = [1, 1]} : vector<64x64xf32> to vector<8x64xf32>
    %21 = vector.extract_strided_slice %8 {offsets = [0, 0], sizes = [8, 32], strides = [1, 1]} : vector<64x32xf32> to vector<8x32xf32>
    %22 = arith.truncf %18 : vector<8x32xf32> to vector<8x32xbf16>
    %cst_15 = arith.constant dense<0.000000e+00> : vector<8x96xf32>
    %23 = tpu.matmul %22, %10, %cst_15 {dimension_numbers = #tpu.dot_dimension_numbers<[1], [0], [0], [1], [0, 0, 1, 1], [], []>} : vector<8x32xbf16>, vector<32x96xbf16>, vector<8x96xf32> -> vector<8x96xf32>
    %24 = vector.extract_strided_slice %23 {offsets = [0, 0], sizes = [8, 64], strides = [1, 1]} : vector<8x96xf32> to vector<8x64xf32>
    %25 = arith.addf %20, %24 : vector<8x64xf32>
    %cst_16 = arith.constant 5.000000e-01 : f32
    %26 = vector.broadcast %cst_16 : f32 to vector<8x64xf32>
    %27 = arith.mulf %26, %25 : vector<8x64xf32>
    %28 = math.tanh %27 : vector<8x64xf32>
    %cst_17 = arith.constant 5.000000e-01 : f32
    %29 = vector.broadcast %cst_17 : f32 to vector<8x64xf32>
    %30 = arith.mulf %29, %28 : vector<8x64xf32>
    %cst_18 = arith.constant 5.000000e-01 : f32
    %31 = vector.broadcast %cst_18 : f32 to vector<8x64xf32>
    %32 = arith.addf %30, %31 : vector<8x64xf32>
    %33 = vector.extract_strided_slice %32 {offsets = [0, 0], sizes = [8, 32], strides = [1, 1]} : vector<8x64xf32> to vector<8x32xf32>
    %34 = vector.extract_strided_slice %32 {offsets = [0, 32], sizes = [8, 32], strides = [1, 1]} : vector<8x64xf32> to vector<8x32xf32>
    %35 = vector.extract_strided_slice %23 {offsets = [0, 64], sizes = [8, 32], strides = [1, 1]} : vector<8x96xf32> to vector<8x32xf32>
    %36 = arith.addf %35, %14 : vector<8x32xf32>
    %37 = arith.mulf %33, %36 : vector<8x32xf32>
    %38 = arith.addf %21, %37 : vector<8x32xf32>
    %39 = math.tanh %38 : vector<8x32xf32>
    %cst_19 = arith.constant 1.000000e+00 : f32
    %40 = vector.broadcast %cst_19 : f32 to vector<8x32xf32>
    %41 = arith.subf %40, %34 : vector<8x32xf32>
    %42 = arith.mulf %41, %39 : vector<8x32xf32>
    %43 = arith.mulf %34, %18 : vector<8x32xf32>
    %44 = arith.addf %42, %43 : vector<8x32xf32>
    %45 = vector.extract_strided_slice %7 {offsets = [56, 0], sizes = [8, 64], strides = [1, 1]} : vector<64x64xf32> to vector<8x64xf32>
    %46 = vector.extract_strided_slice %9 {offsets = [56, 0], sizes = [8, 32], strides = [1, 1]} : vector<64x32xf32> to vector<8x32xf32>
    %47 = arith.truncf %19 : vector<8x32xf32> to vector<8x32xbf16>
    %cst_20 = arith.constant dense<0.000000e+00> : vector<8x96xf32>
    %48 = tpu.matmul %47, %11, %cst_20 {dimension_numbers = #tpu.dot_dimension_numbers<[1], [0], [0], [1], [0, 0, 1, 1], [], []>} : vector<8x32xbf16>, vector<32x96xbf16>, vector<8x96xf32> -> vector<8x96xf32>
    %49 = vector.extract_strided_slice %48 {offsets = [0, 0], sizes = [8, 64], strides = [1, 1]} : vector<8x96xf32> to vector<8x64xf32>
    %50 = arith.addf %45, %49 : vector<8x64xf32>
    %cst_21 = arith.constant 5.000000e-01 : f32
    %51 = vector.broadcast %cst_21 : f32 to vector<8x64xf32>
    %52 = arith.mulf %51, %50 : vector<8x64xf32>
    %53 = math.tanh %52 : vector<8x64xf32>
    %cst_22 = arith.constant 5.000000e-01 : f32
    %54 = vector.broadcast %cst_22 : f32 to vector<8x64xf32>
    %55 = arith.mulf %54, %53 : vector<8x64xf32>
    %cst_23 = arith.constant 5.000000e-01 : f32
    %56 = vector.broadcast %cst_23 : f32 to vector<8x64xf32>
    %57 = arith.addf %55, %56 : vector<8x64xf32>
    %58 = vector.extract_strided_slice %57 {offsets = [0, 0], sizes = [8, 32], strides = [1, 1]} : vector<8x64xf32> to vector<8x32xf32>
    %59 = vector.extract_strided_slice %57 {offsets = [0, 32], sizes = [8, 32], strides = [1, 1]} : vector<8x64xf32> to vector<8x32xf32>
    %60 = vector.extract_strided_slice %48 {offsets = [0, 64], sizes = [8, 32], strides = [1, 1]} : vector<8x96xf32> to vector<8x32xf32>
    %61 = arith.addf %60, %17 : vector<8x32xf32>
    %62 = arith.mulf %58, %61 : vector<8x32xf32>
    %63 = arith.addf %46, %62 : vector<8x32xf32>
    %64 = math.tanh %63 : vector<8x32xf32>
    %cst_24 = arith.constant 1.000000e+00 : f32
    %65 = vector.broadcast %cst_24 : f32 to vector<8x32xf32>
    %66 = arith.subf %65, %59 : vector<8x32xf32>
    %67 = arith.mulf %66, %64 : vector<8x32xf32>
    %68 = arith.mulf %59, %19 : vector<8x32xf32>
    %69 = arith.addf %67, %68 : vector<8x32xf32>
    %70 = vector.extract_strided_slice %6 {offsets = [8, 0], sizes = [8, 64], strides = [1, 1]} : vector<64x64xf32> to vector<8x64xf32>
    %71 = vector.extract_strided_slice %8 {offsets = [8, 0], sizes = [8, 32], strides = [1, 1]} : vector<64x32xf32> to vector<8x32xf32>
    %72 = arith.truncf %44 : vector<8x32xf32> to vector<8x32xbf16>
    %cst_25 = arith.constant dense<0.000000e+00> : vector<8x96xf32>
    %73 = tpu.matmul %72, %10, %cst_25 {dimension_numbers = #tpu.dot_dimension_numbers<[1], [0], [0], [1], [0, 0, 1, 1], [], []>} : vector<8x32xbf16>, vector<32x96xbf16>, vector<8x96xf32> -> vector<8x96xf32>
    %74 = vector.extract_strided_slice %73 {offsets = [0, 0], sizes = [8, 64], strides = [1, 1]} : vector<8x96xf32> to vector<8x64xf32>
    %75 = arith.addf %70, %74 : vector<8x64xf32>
    %cst_26 = arith.constant 5.000000e-01 : f32
    %76 = vector.broadcast %cst_26 : f32 to vector<8x64xf32>
    %77 = arith.mulf %76, %75 : vector<8x64xf32>
    %78 = math.tanh %77 : vector<8x64xf32>
    %cst_27 = arith.constant 5.000000e-01 : f32
    %79 = vector.broadcast %cst_27 : f32 to vector<8x64xf32>
    %80 = arith.mulf %79, %78 : vector<8x64xf32>
    %cst_28 = arith.constant 5.000000e-01 : f32
    %81 = vector.broadcast %cst_28 : f32 to vector<8x64xf32>
    %82 = arith.addf %80, %81 : vector<8x64xf32>
    %83 = vector.extract_strided_slice %82 {offsets = [0, 0], sizes = [8, 32], strides = [1, 1]} : vector<8x64xf32> to vector<8x32xf32>
    %84 = vector.extract_strided_slice %82 {offsets = [0, 32], sizes = [8, 32], strides = [1, 1]} : vector<8x64xf32> to vector<8x32xf32>
    %85 = vector.extract_strided_slice %73 {offsets = [0, 64], sizes = [8, 32], strides = [1, 1]} : vector<8x96xf32> to vector<8x32xf32>
    %86 = arith.addf %85, %14 : vector<8x32xf32>
    %87 = arith.mulf %83, %86 : vector<8x32xf32>
    %88 = arith.addf %71, %87 : vector<8x32xf32>
    %89 = math.tanh %88 : vector<8x32xf32>
    %cst_29 = arith.constant 1.000000e+00 : f32
    %90 = vector.broadcast %cst_29 : f32 to vector<8x32xf32>
    %91 = arith.subf %90, %84 : vector<8x32xf32>
    %92 = arith.mulf %91, %89 : vector<8x32xf32>
    %93 = arith.mulf %84, %44 : vector<8x32xf32>
    %94 = arith.addf %92, %93 : vector<8x32xf32>
    %95 = vector.extract_strided_slice %7 {offsets = [48, 0], sizes = [8, 64], strides = [1, 1]} : vector<64x64xf32> to vector<8x64xf32>
    %96 = vector.extract_strided_slice %9 {offsets = [48, 0], sizes = [8, 32], strides = [1, 1]} : vector<64x32xf32> to vector<8x32xf32>
    %97 = arith.truncf %69 : vector<8x32xf32> to vector<8x32xbf16>
    %cst_30 = arith.constant dense<0.000000e+00> : vector<8x96xf32>
    %98 = tpu.matmul %97, %11, %cst_30 {dimension_numbers = #tpu.dot_dimension_numbers<[1], [0], [0], [1], [0, 0, 1, 1], [], []>} : vector<8x32xbf16>, vector<32x96xbf16>, vector<8x96xf32> -> vector<8x96xf32>
    %99 = vector.extract_strided_slice %98 {offsets = [0, 0], sizes = [8, 64], strides = [1, 1]} : vector<8x96xf32> to vector<8x64xf32>
    %100 = arith.addf %95, %99 : vector<8x64xf32>
    %cst_31 = arith.constant 5.000000e-01 : f32
    %101 = vector.broadcast %cst_31 : f32 to vector<8x64xf32>
    %102 = arith.mulf %101, %100 : vector<8x64xf32>
    %103 = math.tanh %102 : vector<8x64xf32>
    %cst_32 = arith.constant 5.000000e-01 : f32
    %104 = vector.broadcast %cst_32 : f32 to vector<8x64xf32>
    %105 = arith.mulf %104, %103 : vector<8x64xf32>
    %cst_33 = arith.constant 5.000000e-01 : f32
    %106 = vector.broadcast %cst_33 : f32 to vector<8x64xf32>
    %107 = arith.addf %105, %106 : vector<8x64xf32>
    %108 = vector.extract_strided_slice %107 {offsets = [0, 0], sizes = [8, 32], strides = [1, 1]} : vector<8x64xf32> to vector<8x32xf32>
    %109 = vector.extract_strided_slice %107 {offsets = [0, 32], sizes = [8, 32], strides = [1, 1]} : vector<8x64xf32> to vector<8x32xf32>
    %110 = vector.extract_strided_slice %98 {offsets = [0, 64], sizes = [8, 32], strides = [1, 1]} : vector<8x96xf32> to vector<8x32xf32>
    %111 = arith.addf %110, %17 : vector<8x32xf32>
    %112 = arith.mulf %108, %111 : vector<8x32xf32>
    %113 = arith.addf %96, %112 : vector<8x32xf32>
    %114 = math.tanh %113 : vector<8x32xf32>
    %cst_34 = arith.constant 1.000000e+00 : f32
    %115 = vector.broadcast %cst_34 : f32 to vector<8x32xf32>
    %116 = arith.subf %115, %109 : vector<8x32xf32>
    %117 = arith.mulf %116, %114 : vector<8x32xf32>
    %118 = arith.mulf %109, %69 : vector<8x32xf32>
    %119 = arith.addf %117, %118 : vector<8x32xf32>
    %120 = vector.extract_strided_slice %6 {offsets = [16, 0], sizes = [8, 64], strides = [1, 1]} : vector<64x64xf32> to vector<8x64xf32>
    %121 = vector.extract_strided_slice %8 {offsets = [16, 0], sizes = [8, 32], strides = [1, 1]} : vector<64x32xf32> to vector<8x32xf32>
    %122 = arith.truncf %94 : vector<8x32xf32> to vector<8x32xbf16>
    %cst_35 = arith.constant dense<0.000000e+00> : vector<8x96xf32>
    %123 = tpu.matmul %122, %10, %cst_35 {dimension_numbers = #tpu.dot_dimension_numbers<[1], [0], [0], [1], [0, 0, 1, 1], [], []>} : vector<8x32xbf16>, vector<32x96xbf16>, vector<8x96xf32> -> vector<8x96xf32>
    %124 = vector.extract_strided_slice %123 {offsets = [0, 0], sizes = [8, 64], strides = [1, 1]} : vector<8x96xf32> to vector<8x64xf32>
    %125 = arith.addf %120, %124 : vector<8x64xf32>
    %cst_36 = arith.constant 5.000000e-01 : f32
    %126 = vector.broadcast %cst_36 : f32 to vector<8x64xf32>
    %127 = arith.mulf %126, %125 : vector<8x64xf32>
    %128 = math.tanh %127 : vector<8x64xf32>
    %cst_37 = arith.constant 5.000000e-01 : f32
    %129 = vector.broadcast %cst_37 : f32 to vector<8x64xf32>
    %130 = arith.mulf %129, %128 : vector<8x64xf32>
    %cst_38 = arith.constant 5.000000e-01 : f32
    %131 = vector.broadcast %cst_38 : f32 to vector<8x64xf32>
    %132 = arith.addf %130, %131 : vector<8x64xf32>
    %133 = vector.extract_strided_slice %132 {offsets = [0, 0], sizes = [8, 32], strides = [1, 1]} : vector<8x64xf32> to vector<8x32xf32>
    %134 = vector.extract_strided_slice %132 {offsets = [0, 32], sizes = [8, 32], strides = [1, 1]} : vector<8x64xf32> to vector<8x32xf32>
    %135 = vector.extract_strided_slice %123 {offsets = [0, 64], sizes = [8, 32], strides = [1, 1]} : vector<8x96xf32> to vector<8x32xf32>
    %136 = arith.addf %135, %14 : vector<8x32xf32>
    %137 = arith.mulf %133, %136 : vector<8x32xf32>
    %138 = arith.addf %121, %137 : vector<8x32xf32>
    %139 = math.tanh %138 : vector<8x32xf32>
    %cst_39 = arith.constant 1.000000e+00 : f32
    %140 = vector.broadcast %cst_39 : f32 to vector<8x32xf32>
    %141 = arith.subf %140, %134 : vector<8x32xf32>
    %142 = arith.mulf %141, %139 : vector<8x32xf32>
    %143 = arith.mulf %134, %94 : vector<8x32xf32>
    %144 = arith.addf %142, %143 : vector<8x32xf32>
    %145 = vector.extract_strided_slice %7 {offsets = [40, 0], sizes = [8, 64], strides = [1, 1]} : vector<64x64xf32> to vector<8x64xf32>
    %146 = vector.extract_strided_slice %9 {offsets = [40, 0], sizes = [8, 32], strides = [1, 1]} : vector<64x32xf32> to vector<8x32xf32>
    %147 = arith.truncf %119 : vector<8x32xf32> to vector<8x32xbf16>
    %cst_40 = arith.constant dense<0.000000e+00> : vector<8x96xf32>
    %148 = tpu.matmul %147, %11, %cst_40 {dimension_numbers = #tpu.dot_dimension_numbers<[1], [0], [0], [1], [0, 0, 1, 1], [], []>} : vector<8x32xbf16>, vector<32x96xbf16>, vector<8x96xf32> -> vector<8x96xf32>
    %149 = vector.extract_strided_slice %148 {offsets = [0, 0], sizes = [8, 64], strides = [1, 1]} : vector<8x96xf32> to vector<8x64xf32>
    %150 = arith.addf %145, %149 : vector<8x64xf32>
    %cst_41 = arith.constant 5.000000e-01 : f32
    %151 = vector.broadcast %cst_41 : f32 to vector<8x64xf32>
    %152 = arith.mulf %151, %150 : vector<8x64xf32>
    %153 = math.tanh %152 : vector<8x64xf32>
    %cst_42 = arith.constant 5.000000e-01 : f32
    %154 = vector.broadcast %cst_42 : f32 to vector<8x64xf32>
    %155 = arith.mulf %154, %153 : vector<8x64xf32>
    %cst_43 = arith.constant 5.000000e-01 : f32
    %156 = vector.broadcast %cst_43 : f32 to vector<8x64xf32>
    %157 = arith.addf %155, %156 : vector<8x64xf32>
    %158 = vector.extract_strided_slice %157 {offsets = [0, 0], sizes = [8, 32], strides = [1, 1]} : vector<8x64xf32> to vector<8x32xf32>
    %159 = vector.extract_strided_slice %157 {offsets = [0, 32], sizes = [8, 32], strides = [1, 1]} : vector<8x64xf32> to vector<8x32xf32>
    %160 = vector.extract_strided_slice %148 {offsets = [0, 64], sizes = [8, 32], strides = [1, 1]} : vector<8x96xf32> to vector<8x32xf32>
    %161 = arith.addf %160, %17 : vector<8x32xf32>
    %162 = arith.mulf %158, %161 : vector<8x32xf32>
    %163 = arith.addf %146, %162 : vector<8x32xf32>
    %164 = math.tanh %163 : vector<8x32xf32>
    %cst_44 = arith.constant 1.000000e+00 : f32
    %165 = vector.broadcast %cst_44 : f32 to vector<8x32xf32>
    %166 = arith.subf %165, %159 : vector<8x32xf32>
    %167 = arith.mulf %166, %164 : vector<8x32xf32>
    %168 = arith.mulf %159, %119 : vector<8x32xf32>
    %169 = arith.addf %167, %168 : vector<8x32xf32>
    %170 = vector.extract_strided_slice %6 {offsets = [24, 0], sizes = [8, 64], strides = [1, 1]} : vector<64x64xf32> to vector<8x64xf32>
    %171 = vector.extract_strided_slice %8 {offsets = [24, 0], sizes = [8, 32], strides = [1, 1]} : vector<64x32xf32> to vector<8x32xf32>
    %172 = arith.truncf %144 : vector<8x32xf32> to vector<8x32xbf16>
    %cst_45 = arith.constant dense<0.000000e+00> : vector<8x96xf32>
    %173 = tpu.matmul %172, %10, %cst_45 {dimension_numbers = #tpu.dot_dimension_numbers<[1], [0], [0], [1], [0, 0, 1, 1], [], []>} : vector<8x32xbf16>, vector<32x96xbf16>, vector<8x96xf32> -> vector<8x96xf32>
    %174 = vector.extract_strided_slice %173 {offsets = [0, 0], sizes = [8, 64], strides = [1, 1]} : vector<8x96xf32> to vector<8x64xf32>
    %175 = arith.addf %170, %174 : vector<8x64xf32>
    %cst_46 = arith.constant 5.000000e-01 : f32
    %176 = vector.broadcast %cst_46 : f32 to vector<8x64xf32>
    %177 = arith.mulf %176, %175 : vector<8x64xf32>
    %178 = math.tanh %177 : vector<8x64xf32>
    %cst_47 = arith.constant 5.000000e-01 : f32
    %179 = vector.broadcast %cst_47 : f32 to vector<8x64xf32>
    %180 = arith.mulf %179, %178 : vector<8x64xf32>
    %cst_48 = arith.constant 5.000000e-01 : f32
    %181 = vector.broadcast %cst_48 : f32 to vector<8x64xf32>
    %182 = arith.addf %180, %181 : vector<8x64xf32>
    %183 = vector.extract_strided_slice %182 {offsets = [0, 0], sizes = [8, 32], strides = [1, 1]} : vector<8x64xf32> to vector<8x32xf32>
    %184 = vector.extract_strided_slice %182 {offsets = [0, 32], sizes = [8, 32], strides = [1, 1]} : vector<8x64xf32> to vector<8x32xf32>
    %185 = vector.extract_strided_slice %173 {offsets = [0, 64], sizes = [8, 32], strides = [1, 1]} : vector<8x96xf32> to vector<8x32xf32>
    %186 = arith.addf %185, %14 : vector<8x32xf32>
    %187 = arith.mulf %183, %186 : vector<8x32xf32>
    %188 = arith.addf %171, %187 : vector<8x32xf32>
    %189 = math.tanh %188 : vector<8x32xf32>
    %cst_49 = arith.constant 1.000000e+00 : f32
    %190 = vector.broadcast %cst_49 : f32 to vector<8x32xf32>
    %191 = arith.subf %190, %184 : vector<8x32xf32>
    %192 = arith.mulf %191, %189 : vector<8x32xf32>
    %193 = arith.mulf %184, %144 : vector<8x32xf32>
    %194 = arith.addf %192, %193 : vector<8x32xf32>
    %195 = vector.extract_strided_slice %7 {offsets = [32, 0], sizes = [8, 64], strides = [1, 1]} : vector<64x64xf32> to vector<8x64xf32>
    %196 = vector.extract_strided_slice %9 {offsets = [32, 0], sizes = [8, 32], strides = [1, 1]} : vector<64x32xf32> to vector<8x32xf32>
    %197 = arith.truncf %169 : vector<8x32xf32> to vector<8x32xbf16>
    %cst_50 = arith.constant dense<0.000000e+00> : vector<8x96xf32>
    %198 = tpu.matmul %197, %11, %cst_50 {dimension_numbers = #tpu.dot_dimension_numbers<[1], [0], [0], [1], [0, 0, 1, 1], [], []>} : vector<8x32xbf16>, vector<32x96xbf16>, vector<8x96xf32> -> vector<8x96xf32>
    %199 = vector.extract_strided_slice %198 {offsets = [0, 0], sizes = [8, 64], strides = [1, 1]} : vector<8x96xf32> to vector<8x64xf32>
    %200 = arith.addf %195, %199 : vector<8x64xf32>
    %cst_51 = arith.constant 5.000000e-01 : f32
    %201 = vector.broadcast %cst_51 : f32 to vector<8x64xf32>
    %202 = arith.mulf %201, %200 : vector<8x64xf32>
    %203 = math.tanh %202 : vector<8x64xf32>
    %cst_52 = arith.constant 5.000000e-01 : f32
    %204 = vector.broadcast %cst_52 : f32 to vector<8x64xf32>
    %205 = arith.mulf %204, %203 : vector<8x64xf32>
    %cst_53 = arith.constant 5.000000e-01 : f32
    %206 = vector.broadcast %cst_53 : f32 to vector<8x64xf32>
    %207 = arith.addf %205, %206 : vector<8x64xf32>
    %208 = vector.extract_strided_slice %207 {offsets = [0, 0], sizes = [8, 32], strides = [1, 1]} : vector<8x64xf32> to vector<8x32xf32>
    %209 = vector.extract_strided_slice %207 {offsets = [0, 32], sizes = [8, 32], strides = [1, 1]} : vector<8x64xf32> to vector<8x32xf32>
    %210 = vector.extract_strided_slice %198 {offsets = [0, 64], sizes = [8, 32], strides = [1, 1]} : vector<8x96xf32> to vector<8x32xf32>
    %211 = arith.addf %210, %17 : vector<8x32xf32>
    %212 = arith.mulf %208, %211 : vector<8x32xf32>
    %213 = arith.addf %196, %212 : vector<8x32xf32>
    %214 = math.tanh %213 : vector<8x32xf32>
    %cst_54 = arith.constant 1.000000e+00 : f32
    %215 = vector.broadcast %cst_54 : f32 to vector<8x32xf32>
    %216 = arith.subf %215, %209 : vector<8x32xf32>
    %217 = arith.mulf %216, %214 : vector<8x32xf32>
    %218 = arith.mulf %209, %169 : vector<8x32xf32>
    %219 = arith.addf %217, %218 : vector<8x32xf32>
    %220 = vector.extract_strided_slice %6 {offsets = [32, 0], sizes = [8, 64], strides = [1, 1]} : vector<64x64xf32> to vector<8x64xf32>
    %221 = vector.extract_strided_slice %8 {offsets = [32, 0], sizes = [8, 32], strides = [1, 1]} : vector<64x32xf32> to vector<8x32xf32>
    %222 = arith.truncf %194 : vector<8x32xf32> to vector<8x32xbf16>
    %cst_55 = arith.constant dense<0.000000e+00> : vector<8x96xf32>
    %223 = tpu.matmul %222, %10, %cst_55 {dimension_numbers = #tpu.dot_dimension_numbers<[1], [0], [0], [1], [0, 0, 1, 1], [], []>} : vector<8x32xbf16>, vector<32x96xbf16>, vector<8x96xf32> -> vector<8x96xf32>
    %224 = vector.extract_strided_slice %223 {offsets = [0, 0], sizes = [8, 64], strides = [1, 1]} : vector<8x96xf32> to vector<8x64xf32>
    %225 = arith.addf %220, %224 : vector<8x64xf32>
    %cst_56 = arith.constant 5.000000e-01 : f32
    %226 = vector.broadcast %cst_56 : f32 to vector<8x64xf32>
    %227 = arith.mulf %226, %225 : vector<8x64xf32>
    %228 = math.tanh %227 : vector<8x64xf32>
    %cst_57 = arith.constant 5.000000e-01 : f32
    %229 = vector.broadcast %cst_57 : f32 to vector<8x64xf32>
    %230 = arith.mulf %229, %228 : vector<8x64xf32>
    %cst_58 = arith.constant 5.000000e-01 : f32
    %231 = vector.broadcast %cst_58 : f32 to vector<8x64xf32>
    %232 = arith.addf %230, %231 : vector<8x64xf32>
    %233 = vector.extract_strided_slice %232 {offsets = [0, 0], sizes = [8, 32], strides = [1, 1]} : vector<8x64xf32> to vector<8x32xf32>
    %234 = vector.extract_strided_slice %232 {offsets = [0, 32], sizes = [8, 32], strides = [1, 1]} : vector<8x64xf32> to vector<8x32xf32>
    %235 = vector.extract_strided_slice %223 {offsets = [0, 64], sizes = [8, 32], strides = [1, 1]} : vector<8x96xf32> to vector<8x32xf32>
    %236 = arith.addf %235, %14 : vector<8x32xf32>
    %237 = arith.mulf %233, %236 : vector<8x32xf32>
    %238 = arith.addf %221, %237 : vector<8x32xf32>
    %239 = math.tanh %238 : vector<8x32xf32>
    %cst_59 = arith.constant 1.000000e+00 : f32
    %240 = vector.broadcast %cst_59 : f32 to vector<8x32xf32>
    %241 = arith.subf %240, %234 : vector<8x32xf32>
    %242 = arith.mulf %241, %239 : vector<8x32xf32>
    %243 = arith.mulf %234, %194 : vector<8x32xf32>
    %244 = arith.addf %242, %243 : vector<8x32xf32>
    %245 = vector.extract_strided_slice %7 {offsets = [24, 0], sizes = [8, 64], strides = [1, 1]} : vector<64x64xf32> to vector<8x64xf32>
    %246 = vector.extract_strided_slice %9 {offsets = [24, 0], sizes = [8, 32], strides = [1, 1]} : vector<64x32xf32> to vector<8x32xf32>
    %247 = arith.truncf %219 : vector<8x32xf32> to vector<8x32xbf16>
    %cst_60 = arith.constant dense<0.000000e+00> : vector<8x96xf32>
    %248 = tpu.matmul %247, %11, %cst_60 {dimension_numbers = #tpu.dot_dimension_numbers<[1], [0], [0], [1], [0, 0, 1, 1], [], []>} : vector<8x32xbf16>, vector<32x96xbf16>, vector<8x96xf32> -> vector<8x96xf32>
    %249 = vector.extract_strided_slice %248 {offsets = [0, 0], sizes = [8, 64], strides = [1, 1]} : vector<8x96xf32> to vector<8x64xf32>
    %250 = arith.addf %245, %249 : vector<8x64xf32>
    %cst_61 = arith.constant 5.000000e-01 : f32
    %251 = vector.broadcast %cst_61 : f32 to vector<8x64xf32>
    %252 = arith.mulf %251, %250 : vector<8x64xf32>
    %253 = math.tanh %252 : vector<8x64xf32>
    %cst_62 = arith.constant 5.000000e-01 : f32
    %254 = vector.broadcast %cst_62 : f32 to vector<8x64xf32>
    %255 = arith.mulf %254, %253 : vector<8x64xf32>
    %cst_63 = arith.constant 5.000000e-01 : f32
    %256 = vector.broadcast %cst_63 : f32 to vector<8x64xf32>
    %257 = arith.addf %255, %256 : vector<8x64xf32>
    %258 = vector.extract_strided_slice %257 {offsets = [0, 0], sizes = [8, 32], strides = [1, 1]} : vector<8x64xf32> to vector<8x32xf32>
    %259 = vector.extract_strided_slice %257 {offsets = [0, 32], sizes = [8, 32], strides = [1, 1]} : vector<8x64xf32> to vector<8x32xf32>
    %260 = vector.extract_strided_slice %248 {offsets = [0, 64], sizes = [8, 32], strides = [1, 1]} : vector<8x96xf32> to vector<8x32xf32>
    %261 = arith.addf %260, %17 : vector<8x32xf32>
    %262 = arith.mulf %258, %261 : vector<8x32xf32>
    %263 = arith.addf %246, %262 : vector<8x32xf32>
    %264 = math.tanh %263 : vector<8x32xf32>
    %cst_64 = arith.constant 1.000000e+00 : f32
    %265 = vector.broadcast %cst_64 : f32 to vector<8x32xf32>
    %266 = arith.subf %265, %259 : vector<8x32xf32>
    %267 = arith.mulf %266, %264 : vector<8x32xf32>
    %268 = arith.mulf %259, %219 : vector<8x32xf32>
    %269 = arith.addf %267, %268 : vector<8x32xf32>
    %270 = vector.extract_strided_slice %6 {offsets = [40, 0], sizes = [8, 64], strides = [1, 1]} : vector<64x64xf32> to vector<8x64xf32>
    %271 = vector.extract_strided_slice %8 {offsets = [40, 0], sizes = [8, 32], strides = [1, 1]} : vector<64x32xf32> to vector<8x32xf32>
    %272 = arith.truncf %244 : vector<8x32xf32> to vector<8x32xbf16>
    %cst_65 = arith.constant dense<0.000000e+00> : vector<8x96xf32>
    %273 = tpu.matmul %272, %10, %cst_65 {dimension_numbers = #tpu.dot_dimension_numbers<[1], [0], [0], [1], [0, 0, 1, 1], [], []>} : vector<8x32xbf16>, vector<32x96xbf16>, vector<8x96xf32> -> vector<8x96xf32>
    %274 = vector.extract_strided_slice %273 {offsets = [0, 0], sizes = [8, 64], strides = [1, 1]} : vector<8x96xf32> to vector<8x64xf32>
    %275 = arith.addf %270, %274 : vector<8x64xf32>
    %cst_66 = arith.constant 5.000000e-01 : f32
    %276 = vector.broadcast %cst_66 : f32 to vector<8x64xf32>
    %277 = arith.mulf %276, %275 : vector<8x64xf32>
    %278 = math.tanh %277 : vector<8x64xf32>
    %cst_67 = arith.constant 5.000000e-01 : f32
    %279 = vector.broadcast %cst_67 : f32 to vector<8x64xf32>
    %280 = arith.mulf %279, %278 : vector<8x64xf32>
    %cst_68 = arith.constant 5.000000e-01 : f32
    %281 = vector.broadcast %cst_68 : f32 to vector<8x64xf32>
    %282 = arith.addf %280, %281 : vector<8x64xf32>
    %283 = vector.extract_strided_slice %282 {offsets = [0, 0], sizes = [8, 32], strides = [1, 1]} : vector<8x64xf32> to vector<8x32xf32>
    %284 = vector.extract_strided_slice %282 {offsets = [0, 32], sizes = [8, 32], strides = [1, 1]} : vector<8x64xf32> to vector<8x32xf32>
    %285 = vector.extract_strided_slice %273 {offsets = [0, 64], sizes = [8, 32], strides = [1, 1]} : vector<8x96xf32> to vector<8x32xf32>
    %286 = arith.addf %285, %14 : vector<8x32xf32>
    %287 = arith.mulf %283, %286 : vector<8x32xf32>
    %288 = arith.addf %271, %287 : vector<8x32xf32>
    %289 = math.tanh %288 : vector<8x32xf32>
    %cst_69 = arith.constant 1.000000e+00 : f32
    %290 = vector.broadcast %cst_69 : f32 to vector<8x32xf32>
    %291 = arith.subf %290, %284 : vector<8x32xf32>
    %292 = arith.mulf %291, %289 : vector<8x32xf32>
    %293 = arith.mulf %284, %244 : vector<8x32xf32>
    %294 = arith.addf %292, %293 : vector<8x32xf32>
    %295 = vector.extract_strided_slice %7 {offsets = [16, 0], sizes = [8, 64], strides = [1, 1]} : vector<64x64xf32> to vector<8x64xf32>
    %296 = vector.extract_strided_slice %9 {offsets = [16, 0], sizes = [8, 32], strides = [1, 1]} : vector<64x32xf32> to vector<8x32xf32>
    %297 = arith.truncf %269 : vector<8x32xf32> to vector<8x32xbf16>
    %cst_70 = arith.constant dense<0.000000e+00> : vector<8x96xf32>
    %298 = tpu.matmul %297, %11, %cst_70 {dimension_numbers = #tpu.dot_dimension_numbers<[1], [0], [0], [1], [0, 0, 1, 1], [], []>} : vector<8x32xbf16>, vector<32x96xbf16>, vector<8x96xf32> -> vector<8x96xf32>
    %299 = vector.extract_strided_slice %298 {offsets = [0, 0], sizes = [8, 64], strides = [1, 1]} : vector<8x96xf32> to vector<8x64xf32>
    %300 = arith.addf %295, %299 : vector<8x64xf32>
    %cst_71 = arith.constant 5.000000e-01 : f32
    %301 = vector.broadcast %cst_71 : f32 to vector<8x64xf32>
    %302 = arith.mulf %301, %300 : vector<8x64xf32>
    %303 = math.tanh %302 : vector<8x64xf32>
    %cst_72 = arith.constant 5.000000e-01 : f32
    %304 = vector.broadcast %cst_72 : f32 to vector<8x64xf32>
    %305 = arith.mulf %304, %303 : vector<8x64xf32>
    %cst_73 = arith.constant 5.000000e-01 : f32
    %306 = vector.broadcast %cst_73 : f32 to vector<8x64xf32>
    %307 = arith.addf %305, %306 : vector<8x64xf32>
    %308 = vector.extract_strided_slice %307 {offsets = [0, 0], sizes = [8, 32], strides = [1, 1]} : vector<8x64xf32> to vector<8x32xf32>
    %309 = vector.extract_strided_slice %307 {offsets = [0, 32], sizes = [8, 32], strides = [1, 1]} : vector<8x64xf32> to vector<8x32xf32>
    %310 = vector.extract_strided_slice %298 {offsets = [0, 64], sizes = [8, 32], strides = [1, 1]} : vector<8x96xf32> to vector<8x32xf32>
    %311 = arith.addf %310, %17 : vector<8x32xf32>
    %312 = arith.mulf %308, %311 : vector<8x32xf32>
    %313 = arith.addf %296, %312 : vector<8x32xf32>
    %314 = math.tanh %313 : vector<8x32xf32>
    %cst_74 = arith.constant 1.000000e+00 : f32
    %315 = vector.broadcast %cst_74 : f32 to vector<8x32xf32>
    %316 = arith.subf %315, %309 : vector<8x32xf32>
    %317 = arith.mulf %316, %314 : vector<8x32xf32>
    %318 = arith.mulf %309, %269 : vector<8x32xf32>
    %319 = arith.addf %317, %318 : vector<8x32xf32>
    %320 = vector.extract_strided_slice %6 {offsets = [48, 0], sizes = [8, 64], strides = [1, 1]} : vector<64x64xf32> to vector<8x64xf32>
    %321 = vector.extract_strided_slice %8 {offsets = [48, 0], sizes = [8, 32], strides = [1, 1]} : vector<64x32xf32> to vector<8x32xf32>
    %322 = arith.truncf %294 : vector<8x32xf32> to vector<8x32xbf16>
    %cst_75 = arith.constant dense<0.000000e+00> : vector<8x96xf32>
    %323 = tpu.matmul %322, %10, %cst_75 {dimension_numbers = #tpu.dot_dimension_numbers<[1], [0], [0], [1], [0, 0, 1, 1], [], []>} : vector<8x32xbf16>, vector<32x96xbf16>, vector<8x96xf32> -> vector<8x96xf32>
    %324 = vector.extract_strided_slice %323 {offsets = [0, 0], sizes = [8, 64], strides = [1, 1]} : vector<8x96xf32> to vector<8x64xf32>
    %325 = arith.addf %320, %324 : vector<8x64xf32>
    %cst_76 = arith.constant 5.000000e-01 : f32
    %326 = vector.broadcast %cst_76 : f32 to vector<8x64xf32>
    %327 = arith.mulf %326, %325 : vector<8x64xf32>
    %328 = math.tanh %327 : vector<8x64xf32>
    %cst_77 = arith.constant 5.000000e-01 : f32
    %329 = vector.broadcast %cst_77 : f32 to vector<8x64xf32>
    %330 = arith.mulf %329, %328 : vector<8x64xf32>
    %cst_78 = arith.constant 5.000000e-01 : f32
    %331 = vector.broadcast %cst_78 : f32 to vector<8x64xf32>
    %332 = arith.addf %330, %331 : vector<8x64xf32>
    %333 = vector.extract_strided_slice %332 {offsets = [0, 0], sizes = [8, 32], strides = [1, 1]} : vector<8x64xf32> to vector<8x32xf32>
    %334 = vector.extract_strided_slice %332 {offsets = [0, 32], sizes = [8, 32], strides = [1, 1]} : vector<8x64xf32> to vector<8x32xf32>
    %335 = vector.extract_strided_slice %323 {offsets = [0, 64], sizes = [8, 32], strides = [1, 1]} : vector<8x96xf32> to vector<8x32xf32>
    %336 = arith.addf %335, %14 : vector<8x32xf32>
    %337 = arith.mulf %333, %336 : vector<8x32xf32>
    %338 = arith.addf %321, %337 : vector<8x32xf32>
    %339 = math.tanh %338 : vector<8x32xf32>
    %cst_79 = arith.constant 1.000000e+00 : f32
    %340 = vector.broadcast %cst_79 : f32 to vector<8x32xf32>
    %341 = arith.subf %340, %334 : vector<8x32xf32>
    %342 = arith.mulf %341, %339 : vector<8x32xf32>
    %343 = arith.mulf %334, %294 : vector<8x32xf32>
    %344 = arith.addf %342, %343 : vector<8x32xf32>
    %345 = vector.extract_strided_slice %7 {offsets = [8, 0], sizes = [8, 64], strides = [1, 1]} : vector<64x64xf32> to vector<8x64xf32>
    %346 = vector.extract_strided_slice %9 {offsets = [8, 0], sizes = [8, 32], strides = [1, 1]} : vector<64x32xf32> to vector<8x32xf32>
    %347 = arith.truncf %319 : vector<8x32xf32> to vector<8x32xbf16>
    %cst_80 = arith.constant dense<0.000000e+00> : vector<8x96xf32>
    %348 = tpu.matmul %347, %11, %cst_80 {dimension_numbers = #tpu.dot_dimension_numbers<[1], [0], [0], [1], [0, 0, 1, 1], [], []>} : vector<8x32xbf16>, vector<32x96xbf16>, vector<8x96xf32> -> vector<8x96xf32>
    %349 = vector.extract_strided_slice %348 {offsets = [0, 0], sizes = [8, 64], strides = [1, 1]} : vector<8x96xf32> to vector<8x64xf32>
    %350 = arith.addf %345, %349 : vector<8x64xf32>
    %cst_81 = arith.constant 5.000000e-01 : f32
    %351 = vector.broadcast %cst_81 : f32 to vector<8x64xf32>
    %352 = arith.mulf %351, %350 : vector<8x64xf32>
    %353 = math.tanh %352 : vector<8x64xf32>
    %cst_82 = arith.constant 5.000000e-01 : f32
    %354 = vector.broadcast %cst_82 : f32 to vector<8x64xf32>
    %355 = arith.mulf %354, %353 : vector<8x64xf32>
    %cst_83 = arith.constant 5.000000e-01 : f32
    %356 = vector.broadcast %cst_83 : f32 to vector<8x64xf32>
    %357 = arith.addf %355, %356 : vector<8x64xf32>
    %358 = vector.extract_strided_slice %357 {offsets = [0, 0], sizes = [8, 32], strides = [1, 1]} : vector<8x64xf32> to vector<8x32xf32>
    %359 = vector.extract_strided_slice %357 {offsets = [0, 32], sizes = [8, 32], strides = [1, 1]} : vector<8x64xf32> to vector<8x32xf32>
    %360 = vector.extract_strided_slice %348 {offsets = [0, 64], sizes = [8, 32], strides = [1, 1]} : vector<8x96xf32> to vector<8x32xf32>
    %361 = arith.addf %360, %17 : vector<8x32xf32>
    %362 = arith.mulf %358, %361 : vector<8x32xf32>
    %363 = arith.addf %346, %362 : vector<8x32xf32>
    %364 = math.tanh %363 : vector<8x32xf32>
    %cst_84 = arith.constant 1.000000e+00 : f32
    %365 = vector.broadcast %cst_84 : f32 to vector<8x32xf32>
    %366 = arith.subf %365, %359 : vector<8x32xf32>
    %367 = arith.mulf %366, %364 : vector<8x32xf32>
    %368 = arith.mulf %359, %319 : vector<8x32xf32>
    %369 = arith.addf %367, %368 : vector<8x32xf32>
    %370 = vector.extract_strided_slice %6 {offsets = [56, 0], sizes = [8, 64], strides = [1, 1]} : vector<64x64xf32> to vector<8x64xf32>
    %371 = vector.extract_strided_slice %8 {offsets = [56, 0], sizes = [8, 32], strides = [1, 1]} : vector<64x32xf32> to vector<8x32xf32>
    %372 = arith.truncf %344 : vector<8x32xf32> to vector<8x32xbf16>
    %cst_85 = arith.constant dense<0.000000e+00> : vector<8x96xf32>
    %373 = tpu.matmul %372, %10, %cst_85 {dimension_numbers = #tpu.dot_dimension_numbers<[1], [0], [0], [1], [0, 0, 1, 1], [], []>} : vector<8x32xbf16>, vector<32x96xbf16>, vector<8x96xf32> -> vector<8x96xf32>
    %374 = vector.extract_strided_slice %373 {offsets = [0, 0], sizes = [8, 64], strides = [1, 1]} : vector<8x96xf32> to vector<8x64xf32>
    %375 = arith.addf %370, %374 : vector<8x64xf32>
    %cst_86 = arith.constant 5.000000e-01 : f32
    %376 = vector.broadcast %cst_86 : f32 to vector<8x64xf32>
    %377 = arith.mulf %376, %375 : vector<8x64xf32>
    %378 = math.tanh %377 : vector<8x64xf32>
    %cst_87 = arith.constant 5.000000e-01 : f32
    %379 = vector.broadcast %cst_87 : f32 to vector<8x64xf32>
    %380 = arith.mulf %379, %378 : vector<8x64xf32>
    %cst_88 = arith.constant 5.000000e-01 : f32
    %381 = vector.broadcast %cst_88 : f32 to vector<8x64xf32>
    %382 = arith.addf %380, %381 : vector<8x64xf32>
    %383 = vector.extract_strided_slice %382 {offsets = [0, 0], sizes = [8, 32], strides = [1, 1]} : vector<8x64xf32> to vector<8x32xf32>
    %384 = vector.extract_strided_slice %382 {offsets = [0, 32], sizes = [8, 32], strides = [1, 1]} : vector<8x64xf32> to vector<8x32xf32>
    %385 = vector.extract_strided_slice %373 {offsets = [0, 64], sizes = [8, 32], strides = [1, 1]} : vector<8x96xf32> to vector<8x32xf32>
    %386 = arith.addf %385, %14 : vector<8x32xf32>
    %387 = arith.mulf %383, %386 : vector<8x32xf32>
    %388 = arith.addf %371, %387 : vector<8x32xf32>
    %389 = math.tanh %388 : vector<8x32xf32>
    %cst_89 = arith.constant 1.000000e+00 : f32
    %390 = vector.broadcast %cst_89 : f32 to vector<8x32xf32>
    %391 = arith.subf %390, %384 : vector<8x32xf32>
    %392 = arith.mulf %391, %389 : vector<8x32xf32>
    %393 = arith.mulf %384, %344 : vector<8x32xf32>
    %394 = arith.addf %392, %393 : vector<8x32xf32>
    %395 = vector.extract_strided_slice %7 {offsets = [0, 0], sizes = [8, 64], strides = [1, 1]} : vector<64x64xf32> to vector<8x64xf32>
    %396 = vector.extract_strided_slice %9 {offsets = [0, 0], sizes = [8, 32], strides = [1, 1]} : vector<64x32xf32> to vector<8x32xf32>
    %397 = arith.truncf %369 : vector<8x32xf32> to vector<8x32xbf16>
    %cst_90 = arith.constant dense<0.000000e+00> : vector<8x96xf32>
    %398 = tpu.matmul %397, %11, %cst_90 {dimension_numbers = #tpu.dot_dimension_numbers<[1], [0], [0], [1], [0, 0, 1, 1], [], []>} : vector<8x32xbf16>, vector<32x96xbf16>, vector<8x96xf32> -> vector<8x96xf32>
    %399 = vector.extract_strided_slice %398 {offsets = [0, 0], sizes = [8, 64], strides = [1, 1]} : vector<8x96xf32> to vector<8x64xf32>
    %400 = arith.addf %395, %399 : vector<8x64xf32>
    %cst_91 = arith.constant 5.000000e-01 : f32
    %401 = vector.broadcast %cst_91 : f32 to vector<8x64xf32>
    %402 = arith.mulf %401, %400 : vector<8x64xf32>
    %403 = math.tanh %402 : vector<8x64xf32>
    %cst_92 = arith.constant 5.000000e-01 : f32
    %404 = vector.broadcast %cst_92 : f32 to vector<8x64xf32>
    %405 = arith.mulf %404, %403 : vector<8x64xf32>
    %cst_93 = arith.constant 5.000000e-01 : f32
    %406 = vector.broadcast %cst_93 : f32 to vector<8x64xf32>
    %407 = arith.addf %405, %406 : vector<8x64xf32>
    %408 = vector.extract_strided_slice %407 {offsets = [0, 0], sizes = [8, 32], strides = [1, 1]} : vector<8x64xf32> to vector<8x32xf32>
    %409 = vector.extract_strided_slice %407 {offsets = [0, 32], sizes = [8, 32], strides = [1, 1]} : vector<8x64xf32> to vector<8x32xf32>
    %410 = vector.extract_strided_slice %398 {offsets = [0, 64], sizes = [8, 32], strides = [1, 1]} : vector<8x96xf32> to vector<8x32xf32>
    %411 = arith.addf %410, %17 : vector<8x32xf32>
    %412 = arith.mulf %408, %411 : vector<8x32xf32>
    %413 = arith.addf %396, %412 : vector<8x32xf32>
    %414 = math.tanh %413 : vector<8x32xf32>
    %cst_94 = arith.constant 1.000000e+00 : f32
    %415 = vector.broadcast %cst_94 : f32 to vector<8x32xf32>
    %416 = arith.subf %415, %409 : vector<8x32xf32>
    %417 = arith.mulf %416, %414 : vector<8x32xf32>
    %418 = arith.mulf %409, %369 : vector<8x32xf32>
    %419 = arith.addf %417, %418 : vector<8x32xf32>
    %420 = arith.truncf %419 : vector<8x32xf32> to vector<8x32xbf16>
    %c0_95 = arith.constant 0 : index
    %c0_96 = arith.constant 0 : index
    %421 = vector.load %arg7[%c0_95, %c0_96] : memref<32x4xbf16, #tpu.memory_space<vmem>>, vector<32x4xbf16>
    %cst_97 = arith.constant dense<0.000000e+00> : vector<8x4xf32>
    %422 = tpu.matmul %420, %421, %cst_97 {dimension_numbers = #tpu.dot_dimension_numbers<[1], [0], [0], [1], [0, 0, 1, 1], [], []>} : vector<8x32xbf16>, vector<32x4xbf16>, vector<8x4xf32> -> vector<8x4xf32>
    %423 = arith.truncf %394 : vector<8x32xf32> to vector<8x32xbf16>
    %c0_98 = arith.constant 0 : index
    %c0_99 = arith.constant 0 : index
    %424 = vector.load %arg8[%c0_98, %c0_99] : memref<32x4xbf16, #tpu.memory_space<vmem>>, vector<32x4xbf16>
    %cst_100 = arith.constant dense<0.000000e+00> : vector<8x4xf32>
    %425 = tpu.matmul %423, %424, %cst_100 {dimension_numbers = #tpu.dot_dimension_numbers<[1], [0], [0], [1], [0, 0, 1, 1], [], []>} : vector<8x32xbf16>, vector<32x4xbf16>, vector<8x4xf32> -> vector<8x4xf32>
    %426 = arith.addf %422, %425 : vector<8x4xf32>
    %c0_101 = arith.constant 0 : index
    %c0_102 = arith.constant 0 : index
    %427 = vector.load %arg9[%c0_101, %c0_102] : memref<1x4xf32, #tpu.memory_space<vmem>>, vector<1x4xf32>
    %428 = vector.broadcast %427 : vector<1x4xf32> to vector<8x4xf32>
    %429 = arith.addf %426, %428 : vector<8x4xf32>
    %c0_103 = arith.constant 0 : index
    %c0_104 = arith.constant 0 : index
    %430 = vector.load %arg10[%c0_103, %c0_104] : memref<8x4xf32, #tpu.memory_space<vmem>>, vector<8x4xf32>
    tpu.vector_store %arg10[%c0_103, %c0_104], %429 {strides = array<i32>} : memref<8x4xf32, #tpu.memory_space<vmem>>, vector<8x4xf32>,
    return
  }
}

</mosaic_0001>

<bundles_post_ra>
// kernel: tpu_custom_call.1
= control target key start
LH: loop header
LB: loop body
LE: loop exit
PB: predicated region body
PF: predicated region fallthrough
CT: control target
= control target key end

     0   :  { %vm2975_vm0 = vmmov 0   ;;  %s2977_s11 = smov 64   ;;  %vm1019_vm1 = vcmask 261120   ;;  %vm2281_vm2 = vcmask 31744   ;;  %s3921_s1 = inlined_call_operand.vmem [shape: bf16[768,192], index: 1, kind: input, shape index: {}]   ;;  %s3922_s0 = inlined_call_operand.vmem [shape: bf16[64,768], index: 0, kind: input, shape index: {}]   ;;  %s3923_s3 = inlined_call_operand.vmem [shape: bf16[32,96], index: 3, kind: input, shape index: {}]   ;;  %s3924_s4 = inlined_call_operand.vmem [shape: bf16[32,96], index: 4, kind: input, shape index: {}]   ;;  %s3925_s6 = inlined_call_operand.vmem [shape: f32[1,32], index: 6, kind: input, shape index: {}]   ;;  %s3926_s2 = inlined_call_operand.vmem [shape: f32[1,192], index: 2, kind: input, shape index: {}]   ;;  %s3927_s5 = inlined_call_operand.vmem [shape: f32[1,32], index: 5, kind: input, shape index: {}]   ;;  %s3928_s8 = inlined_call_operand.vmem [shape: bf16[32,4], index: 8, kind: input, shape index: {}]   ;;  %s3929_s7 = inlined_call_operand.vmem [shape: bf16[32,4], index: 7, kind: input, shape index: {}]   ;;  %s3930_s9 = inlined_call_operand.vmem [shape: f32[1,4], index: 9, kind: input, shape index: {}]   ;;  %s3931_s10 = inlined_call_operand.vmem [shape: f32[8,4], index: 10, kind: output, shape index: {}]  }
   0x1   :  { %v2718_v0 = vld [vmem:[%s3921_s1 + $0x4] ss:$8 sps:$4 sm:$0xff]   ;;  %v2722_v2 = vld [vmem:[%s3921_s1] ss:$8 sps:$4 sm:$0xff]   ;;  %v2724_v4 = vld [vmem:[%s3921_s1 + $0x14] ss:$8 sps:$4 sm:$0xff]  }
   0x2   :  { %v3041_v1 = vld [vmem:[%s3921_s1 + $0x204] ss:$8 sps:$4 sm:$0xff]   ;;  %768 = vmatprep.subr.bf16.mxu0 %v2718_v0  ;;  %v3049_v3 = vld [vmem:[%s3921_s1 + $0x200] ss:$8 sps:$4 sm:$0xff]   ;;  %v3059_v5 = vld [vmem:[%s3921_s1 + $0x214] ss:$8 sps:$4 sm:$0xff]  }
   0x3   :  { %2632 = vmatprep.subr.bf16.mxu1 %v3041_v1  ;;  %769 = vmatpush1.bf16.msra.mxu0 %v2722_v2  ;;  %v2728_v6 = vld [vmem:[%s3921_s1 + $0x10] ss:$8 sps:$4 sm:$0xff]   ;;  %v2730_v8 = vld [vmem:[%s3921_s1 + $0x24] ss:$8 sps:$4 sm:$0xff]   ;;  %v2734_v10 = vld [vmem:[%s3921_s1 + $0x20] ss:$8 sps:$4 sm:$0xff]  }
   0x4   :  { %2648 = vmatpush1.bf16.msra.mxu1 %v3049_v3  ;;  %770 = vmatprep.subr.bf16.mxu0 %v2724_v4  ;;  %v3067_v7 = vld [vmem:[%s3921_s1 + $0x210] ss:$8 sps:$4 sm:$0xff]   ;;  %v3076_v9 = vld [vmem:[%s3921_s1 + $0x224] ss:$8 sps:$4 sm:$0xff]   ;;  %v3084_v11 = vld [vmem:[%s3921_s1 + $0x220] ss:$8 sps:$4 sm:$0xff]  }
   0x5   :  { %2633 = vmatprep.subr.bf16.mxu1 %v3059_v5  ;;  %v2736_v12 = vld [vmem:[%s3921_s1 + $0x34] ss:$8 sps:$4 sm:$0xff]   ;;  %v2740_v14 = vld [vmem:[%s3921_s1 + $0x30] ss:$8 sps:$4 sm:$0xff]   ;;  %v2742_v16 = vld [vmem:[%s3921_s1 + $0x44] ss:$8 sps:$4 sm:$0xff]  }
   0x6   :  { %v3094_v13 = vld [vmem:[%s3921_s1 + $0x234] ss:$8 sps:$4 sm:$0xff]   ;;  %v3103_v15 = vld [vmem:[%s3921_s1 + $0x230] ss:$8 sps:$4 sm:$0xff]   ;;  %v3112_v17 = vld [vmem:[%s3921_s1 + $0x244] ss:$8 sps:$4 sm:$0xff]  }
   0x7   :  { %771 = vmatpush1.bf16.msra.mxu0 %v2728_v6  ;;  %v2746_v18 = vld [vmem:[%s3921_s1 + $0x40] ss:$8 sps:$4 sm:$0xff]   ;;  %v2748_v20 = vld [vmem:[%s3921_s1 + $0x54] ss:$8 sps:$4 sm:$0xff]   ;;  %v2752_v22 = vld [vmem:[%s3921_s1 + $0x50] ss:$8 sps:$4 sm:$0xff]  }
   0x8   :  { %2649 = vmatpush1.bf16.msra.mxu1 %v3067_v7  ;;  %772 = vmatprep.subr.bf16.mxu0 %v2730_v8  ;;  %v3120_v19 = vld [vmem:[%s3921_s1 + $0x240] ss:$8 sps:$4 sm:$0xff]   ;;  %v3130_v21 = vld [vmem:[%s3921_s1 + $0x254] ss:$8 sps:$4 sm:$0xff]   ;;  %v3139_v23 = vld [vmem:[%s3921_s1 + $0x250] ss:$8 sps:$4 sm:$0xff]  }
   0x9   :  { %2634 = vmatprep.subr.bf16.mxu1 %v3076_v9  ;;  %v2754_v24 = vld [vmem:[%s3921_s1 + $0x64] ss:$8 sps:$4 sm:$0xff]   ;;  %v2758_v26 = vld [vmem:[%s3921_s1 + $0x60] ss:$8 sps:$4 sm:$0xff]   ;;  %v2760_v28 = vld [vmem:[%s3921_s1 + $0x74] ss:$8 sps:$4 sm:$0xff]  }
   0xa   :  { %v3148_v25 = vld [vmem:[%s3921_s1 + $0x264] ss:$8 sps:$4 sm:$0xff]   ;;  %v3156_v27 = vld [vmem:[%s3921_s1 + $0x260] ss:$8 sps:$4 sm:$0xff]   ;;  %v3166_v29 = vld [vmem:[%s3921_s1 + $0x274] ss:$8 sps:$4 sm:$0xff]  }
   0xb   :  { %773 = vmatpush1.bf16.msra.mxu0 %v2734_v10  ;;  %v2764_v30 = vld [vmem:[%s3921_s1 + $0x70] ss:$8 sps:$4 sm:$0xff]   ;;  %v2766_v32 = vld [vmem:[%s3921_s1 + $0x84] ss:$8 sps:$4 sm:$0xff]   ;;  %v2770_v34 = vld [vmem:[%s3921_s1 + $0x80] ss:$8 sps:$4 sm:$0xff]  }
   0xc   :  { %2650 = vmatpush1.bf16.msra.mxu1 %v3084_v11  ;;  %774 = vmatprep.subr.bf16.mxu0 %v2736_v12  ;;  %v3175_v31 = vld [vmem:[%s3921_s1 + $0x270] ss:$8 sps:$4 sm:$0xff]   ;;  %v3184_v33 = vld [vmem:[%s3921_s1 + $0x284] ss:$8 sps:$4 sm:$0xff]   ;;  %v3192_v35 = vld [vmem:[%s3921_s1 + $0x280] ss:$8 sps:$4 sm:$0xff]  }
   0xd   :  { %2635 = vmatprep.subr.bf16.mxu1 %v3094_v13  ;;  %v2772_v36 = vld [vmem:[%s3921_s1 + $0x94] ss:$8 sps:$4 sm:$0xff]   ;;  %v2776_v38 = vld [vmem:[%s3921_s1 + $0x90] ss:$8 sps:$4 sm:$0xff]   ;;  %v2778_v40 = vld [vmem:[%s3921_s1 + $0xa4] ss:$8 sps:$4 sm:$0xff]  }
   0xe   :  { %v3202_v37 = vld [vmem:[%s3921_s1 + $0x294] ss:$8 sps:$4 sm:$0xff]   ;;  %v3211_v39 = vld [vmem:[%s3921_s1 + $0x290] ss:$8 sps:$4 sm:$0xff]   ;;  %v3220_v41 = vld [vmem:[%s3921_s1 + $0x2a4] ss:$8 sps:$4 sm:$0xff]  }
   0xf   :  { %775 = vmatpush1.bf16.msra.mxu0 %v2740_v14  ;;  %v2782_v42 = vld [vmem:[%s3921_s1 + $0xa0] ss:$8 sps:$4 sm:$0xff]   ;;  %v2784_v44 = vld [vmem:[%s3921_s1 + $0xb4] ss:$8 sps:$4 sm:$0xff]   ;;  %v2788_v46 = vld [vmem:[%s3921_s1 + $0xb0] ss:$8 sps:$4 sm:$0xff]  }
  0x10   :  { %2651 = vmatpush1.bf16.msra.mxu1 %v3103_v15  ;;  %776 = vmatprep.subr.bf16.mxu0 %v2742_v16  ;;  %v3228_v43 = vld [vmem:[%s3921_s1 + $0x2a0] ss:$8 sps:$4 sm:$0xff]   ;;  %v3238_v45 = vld [vmem:[%s3921_s1 + $0x2b4] ss:$8 sps:$4 sm:$0xff]   ;;  %v3246_v47 = vld [vmem:[%s3921_s1 + $0x2b0] ss:$8 sps:$4 sm:$0xff]  }
  0x11   :  { %2636 = vmatprep.subr.bf16.mxu1 %v3112_v17  ;;  %v2790_v48 = vld [vmem:[%s3921_s1 + $0xc4] ss:$8 sps:$4 sm:$0xff]   ;;  %v2794_v52 = vld [vmem:[%s3921_s1 + $0xc0] ss:$8 sps:$4 sm:$0xff]   ;;  %v2796_v54 = vld [vmem:[%s3921_s1 + $0xd4] ss:$8 sps:$4 sm:$0xff]  }
  0x12   :  { %v2816_v49 = vld [vmem:[%s3922_s0 + $0xa4] ss:$24 sps:$4 sm:$0xff]   ;;  %v3271_v53 = vld [vmem:[%s3921_s1 + $0x2c0] ss:$8 sps:$4 sm:$0xff]   ;;  %v2800_v56 = vld [vmem:[%s3921_s1 + $0xd0] ss:$8 sps:$4 sm:$0xff]  }
  0x13   :  { %777 = vmatpush1.bf16.msra.mxu0 %v2746_v18  ;;  %v3258_v50 = vld [vmem:[%s3921_s1 + $0x2c4] ss:$8 sps:$4 sm:$0xff]   ;;  %976 = vmatprep.mubr.bf16.mxu1 %v2816_v49  ;;  %v3280_v55 = vld [vmem:[%s3921_s1 + $0x2d4] ss:$8 sps:$4 sm:$0xff]   ;;  %v3289_v57 = vld [vmem:[%s3921_s1 + $0x2d0] ss:$8 sps:$4 sm:$0xff]  }
  0x14   :  { %2652 = vmatpush1.bf16.msra.mxu1 %v3120_v19  ;;  %778 = vmatprep.subr.bf16.mxu0 %v2748_v20  ;;  %v2819_v51 = vld [vmem:[%s3922_s0 + $0x4] ss:$24 sps:$4 sm:$0xff]   ;;  %v2806_v60 = vld [vmem:[%s3921_s1 + $0xe0] ss:$8 sps:$4 sm:$0xff]   ;;  %v2812_v0 = vld [vmem:[%s3921_s1 + $0xf0] ss:$8 sps:$4 sm:$0xff]  }
  0x15   :  { %2637 = vmatprep.subr.bf16.mxu1 %v3130_v21  ;;  %800 = vmatprep.mubr.bf16.mxu0 %v2819_v51  ;;  %v2802_v58 = vld [vmem:[%s3921_s1 + $0xe4] ss:$8 sps:$4 sm:$0xff]   ;;  %v3306_v61 = vld [vmem:[%s3921_s1 + $0x2e0] ss:$8 sps:$4 sm:$0xff]   ;;  %v2808_v62 = vld [vmem:[%s3921_s1 + $0xf4] ss:$8 sps:$4 sm:$0xff]  }
  0x16   :  { %v3298_v59 = vld [vmem:[%s3921_s1 + $0x2e4] ss:$8 sps:$4 sm:$0xff]   ;;  %v3316_v63 = vld [vmem:[%s3921_s1 + $0x2f4] ss:$8 sps:$4 sm:$0xff]   ;;  %v3325_v2 = vld [vmem:[%s3921_s1 + $0x2f0] ss:$8 sps:$4 sm:$0xff]  }
  0x17   :  { %779 = vmatpush1.bf16.msra.mxu0 %v2752_v22  ;;  %v2822_v4 = vld [vmem:[%s3921_s1 + $0x104] ss:$8 sps:$4 sm:$0xff]   ;;  %v2814_v6 = vld [vmem:[%s3922_s0 + $0xa0] ss:$24 sps:$4 sm:$0xff]   ;;  %v2974_v14 = vmov 0.0  }
  0x18   :  { %2653 = vmatpush1.bf16.msra.mxu1 %v3139_v23  ;;  %780 = vmatprep.subr.bf16.mxu0 %v2754_v24  ;;  %v2817_v8 = vld [vmem:[%s3922_s0] ss:$24 sps:$4 sm:$0xff]   ;;  %v2826_v16 = vld [vmem:[%s3921_s1 + $0x114] ss:$8 sps:$4 sm:$0xff]   ;;  %v3360_v22 = vld [vmem:[%s3923_s3 + $0x8] sm:$0xff]  }
  0x19   :  { %2638 = vmatprep.subr.bf16.mxu1 %v3148_v25  ;;  %v2820_v10 = vld [vmem:[%s3921_s1 + $0x100] ss:$8 sps:$4 sm:$0xff]   ;;  %v2854_v18 = vld [vmem:[%s3922_s0 + $0x34] ss:$24 sps:$4 sm:$0xff]   ;;  %v2824_v20 = vld [vmem:[%s3921_s1 + $0x110] ss:$8 sps:$4 sm:$0xff]  }
  0x1a   :  { %v3344_v12 = vld [vmem:[%s3923_s3] sm:$0xff]   ;;  %v2841_v51 = vld [vmem:[%s3921_s1 + $0x154] ss:$8 sps:$4 sm:$0xff]  }
  0x1b   :  { %781 = vmatpush1.bf16.msra.mxu0 %v2758_v26  ;;  %v2830_v24 = vld [vmem:[%s3921_s1 + $0x124] ss:$8 sps:$4 sm:$0xff]   ;;  %v2828_v26 = vld [vmem:[%s3921_s1 + $0x120] ss:$8 sps:$4 sm:$0xff]  }
  0x1c   :  { %2654 = vmatpush1.bf16.msra.mxu1 %v3156_v27  ;;  %782 = vmatprep.subr.bf16.mxu0 %v2760_v28  ;;  %v2856_v28 = vld [vmem:[%s3922_s0 + $0x30] ss:$24 sps:$4 sm:$0xff]   ;;  %v2408_v49 = vld [vmem:[%s3925_s6] ss:$0 sm:$0xff] }
  0x1d   :  { %2639 = vmatprep.subr.bf16.mxu1 %v3166_v29  ;;  %1148 = vrot.lane.b32.xlu1 %v2408_v49, %s2977_s11  ;;  %v2886_v49 = vld [vmem:[%s3922_s0 + $0x38] ss:$24 sps:$4 sm:$0xff]  }
  0x1f   :  { %783 = vmatpush1.bf16.msra.mxu0 %v2764_v30  ;;  %v3378_v30 = vld [vmem:[%s3924_s4] sm:$0xff]  }
  0x20   :  { %2655 = vmatpush1.bf16.msra.mxu1 %v3175_v31  ;;  %784 = vmatprep.subr.bf16.mxu0 %v2766_v32  ;;  %v2834_v32 = vld [vmem:[%s3921_s1 + $0x134] ss:$8 sps:$4 sm:$0xff]  }
  0x21   :  { %2640 = vmatprep.subr.bf16.mxu1 %v3184_v33 }
  0x23   :  { %785 = vmatpush1.bf16.msra.mxu0 %v2770_v34  ;;  %v2863_v34 = vld [vmem:[%s3922_s0 + $0x64] ss:$24 sps:$4 sm:$0xff]  }
  0x24   :  { %2656 = vmatpush1.bf16.msra.mxu1 %v3192_v35  ;;  %786 = vmatprep.subr.bf16.mxu0 %v2772_v36  ;;  %v2976_v36 = vmov 0  }
  0x25   :  { %2641 = vmatprep.subr.bf16.mxu1 %v3202_v37 }
  0x27   :  { %787 = vmatpush1.bf16.msra.mxu0 %v2776_v38  ;;  %v2832_v38 = vld [vmem:[%s3921_s1 + $0x130] ss:$8 sps:$4 sm:$0xff]  }
  0x28   :  { %2657 = vmatpush1.bf16.msra.mxu1 %v3211_v39  ;;  %788 = vmatprep.subr.bf16.mxu0 %v2778_v40  ;;  %v3394_v40 = vld [vmem:[%s3924_s4 + $0x8] sm:$0xff]  }
  0x29   :  { %2642 = vmatprep.subr.bf16.mxu1 %v3220_v41 }
  0x2b   :  { %789 = vmatpush1.bf16.msra.mxu0 %v2782_v42  ;;  %v2838_v42 = vld [vmem:[%s3921_s1 + $0x144] ss:$8 sps:$4 sm:$0xff]  }
  0x2c   :  { %2658 = vmatpush1.bf16.msra.mxu1 %v3228_v43  ;;  %790 = vmatprep.subr.bf16.mxu0 %v2784_v44  ;;  %v2836_v44 = vld [vmem:[%s3921_s1 + $0x140] ss:$8 sps:$4 sm:$0xff]  }
  0x2d   :  { %2643 = vmatprep.subr.bf16.mxu1 %v3238_v45 }
  0x2f   :  { %791 = vmatpush1.bf16.msra.mxu0 %v2788_v46  ;;  %v2865_v46 = vld [vmem:[%s3922_s0 + $0x60] ss:$24 sps:$4 sm:$0xff]  }
  0x30   :  { %2659 = vmatpush1.bf16.msra.mxu1 %v3246_v47  ;;  %792 = vmatprep.subr.bf16.mxu0 %v2790_v48  ;;  %v2872_v48 = vld [vmem:[%s3922_s0 + $0x94] ss:$24 sps:$4 sm:$0xff]  }
  0x31   :  { %2644 = vmatprep.subr.bf16.mxu1 %v3258_v50 }
  0x33   :  { %793 = vmatpush1.bf16.msra.mxu0 %v2794_v52  ;;  %v2839_v52 = vld [vmem:[%s3921_s1 + $0x150] ss:$8 sps:$4 sm:$0xff]  }
  0x34   :  { %2660 = vmatpush1.bf16.msra.mxu1 %v3271_v53  ;;  %794 = vmatprep.subr.bf16.mxu0 %v2796_v54  ;;  %v2844_v54 = vld [vmem:[%s3921_s1 + $0x164] ss:$8 sps:$4 sm:$0xff]  }
  0x35   :  { %2645 = vmatprep.subr.bf16.mxu1 %v3280_v55 }
  0x37   :  { %795 = vmatpush1.bf16.msra.mxu0 %v2800_v56  ;;  %v2874_v56 = vld [vmem:[%s3922_s0 + $0x90] ss:$24 sps:$4 sm:$0xff]  }
  0x38   :  { %2661 = vmatpush1.bf16.msra.mxu1 %v3289_v57  ;;  %796 = vmatprep.subr.bf16.mxu0 %v2802_v58  ;;  %v2842_v58 = vld [vmem:[%s3921_s1 + $0x160] ss:$8 sps:$4 sm:$0xff]  }
  0x39   :  { %2646 = vmatprep.subr.bf16.mxu1 %v3298_v59 }
  0x3b   :  { %797 = vmatpush1.bf16.msra.mxu0 %v2806_v60  ;;  %v2883_v60 = vld [vmem:[%s3922_s0 + $0xc] ss:$24 sps:$4 sm:$0xff]  }
  0x3c   :  { %2662 = vmatpush1.bf16.msra.mxu1 %v3306_v61  ;;  %798 = vmatprep.subr.bf16.mxu0 %v2808_v62  ;;  %v2847_v62 = vld [vmem:[%s3921_s1 + $0x174] ss:$8 sps:$4 sm:$0xff]  }
  0x3d   :  { %2647 = vmatprep.subr.bf16.mxu1 %v3316_v63 }
  0x3f   :  { %799 = vmatpush1.bf16.msra.mxu0 %v2812_v0  ;;  %v2845_v0 = vld [vmem:[%s3921_s1 + $0x170] ss:$8 sps:$4 sm:$0xff]  }
  0x40   :  { %2663 = vmatpush1.bf16.msra.mxu1 %v3325_v2  ;;  %841 = vmatprep.subr.bf16.mxu0 %v2822_v4  ;;  %v2850_v4 = vld [vmem:[%s3921_s1 + $0x184] ss:$8 sps:$4 sm:$0xff]  }
  0x41   :  { %2488 = vmatprep.subr.bf16.mxu1 %v2974_v14 }
  0x42   :  { %801 = vmatmul.mubr.bf16.vlgmr.msra.gmra.mrb[0].mxu0 %v2817_v8  ;;  %v2853_v8 = vld [vmem:[%s3921_s1 + $0x194] ss:$8 sps:$4 sm:$0xff]  }
  0x43   :  { %977 = vmatmul.mubr.bf16.vlgmr.msra.gmra.mrb[0].mxu1 %v2814_v6  ;;  %842 = vmatpush1.bf16.msra.mxu0 %v2820_v10  ;;  %v2848_v6 = vld [vmem:[%s3921_s1 + $0x180] ss:$8 sps:$4 sm:$0xff]   ;;  %v2851_v10 = vld [vmem:[%s3921_s1 + $0x190] ss:$8 sps:$4 sm:$0xff]  }
  0x44   :  { %2489 = vmatpush3.bf16.msra.mxu1 %v3344_v12  ;;  %843 = vmatprep.subr.bf16.mxu0 %v2826_v16  ;;  %v2859_v16 = vld [vmem:[%s3921_s1 + $0x1a4] ss:$8 sps:$4 sm:$0xff]  }
  0x45   :  { %2490 = vmatprep.subr.bf16.mxu1 %v2974_v14  ;;  %2492 = vmatprep.mubr.msk.bf16.mxu1 %vm2975_vm0, %v2974_v14 }
  0x46   :  { %810 = vmatprep.mubr.bf16.mxu0 %v2854_v18  ;;  %v2857_v18 = vld [vmem:[%s3921_s1 + $0x1a0] ss:$8 sps:$4 sm:$0xff]  }
  0x47   :  { %844 = vmatpush1.bf16.msra.mxu0 %v2824_v20  ;;  %v2862_v20 = vld [vmem:[%s3921_s1 + $0x1b4] ss:$8 sps:$4 sm:$0xff]  }
  0x48   :  { %2491 = vmatpush3.bf16.msra.mxu1 %v3360_v22  ;;  %845 = vmatprep.subr.bf16.mxu0 %v2830_v24  ;;  %v2860_v24 = vld [vmem:[%s3921_s1 + $0x1b0] ss:$8 sps:$4 sm:$0xff]  }
  0x49   :  { %2496 = vmatprep.subr.bf16.mxu1 %v2974_v14 }
  0x4a   :  { %811 = vmatmul.mubr.bf16.gmra.mrb[4].mxu0 %v2856_v28  ;;  %v2866_v28 = vld [vmem:[%s3921_s1 + $0x1c0] ss:$8 sps:$4 sm:$0xff]  }
  0x4b   :  { %2493 = vmatmul.mubr.bf16.vlgmr.msra.gmra.mrb[4].mxu1 %v2976_v36  ;;  %846 = vmatpush1.bf16.msra.mxu0 %v2828_v26  ;;  %v2868_v26 = vld [vmem:[%s3921_s1 + $0x1c4] ss:$8 sps:$4 sm:$0xff]  }
  0x4c   :  { %2497 = vmatpush3.bf16.msra.mxu1 %v3378_v30  ;;  %847 = vmatprep.subr.bf16.mxu0 %v2834_v32  ;;  %v2871_v32 = vld [vmem:[%s3921_s1 + $0x1d4] ss:$8 sps:$4 sm:$0xff]  }
  0x4d   :  { %2498 = vmatprep.subr.bf16.mxu1 %v2974_v14  ;;  %2500 = vmatprep.mubr.msk.bf16.mxu1 %vm2975_vm0, %v2974_v14 }
  0x4e   :  { %820 = vmatprep.mubr.bf16.mxu0 %v2863_v34  ;;  %v2869_v34 = vld [vmem:[%s3921_s1 + $0x1d0] ss:$8 sps:$4 sm:$0xff]  }
  0x4f   :  { %848 = vmatpush1.bf16.msra.mxu0 %v2832_v38  ;;  %v2875_v38 = vld [vmem:[%s3921_s1 + $0x1e0] ss:$8 sps:$4 sm:$0xff]  }
  0x50   :  { %2499 = vmatpush3.bf16.msra.mxu1 %v3394_v40  ;;  %849 = vmatprep.subr.bf16.mxu0 %v2838_v42  ;;  %v2880_v42 = vld [vmem:[%s3921_s1 + $0x1f4] ss:$8 sps:$4 sm:$0xff]  }
  0x51   :  { %2504 = vmatprep.subr.bf16.mxu1 %v2974_v14 }
  0x52   :  { %821 = vmatmul.mubr.bf16.gmra.mrb[8].mxu0 %v2865_v46  ;;  %v2881_v46 = vld [vmem:[%s3922_s0 + $0x8] ss:$24 sps:$4 sm:$0xff]  }
  0x53   :  { %2501 = vmatmul.mubr.bf16.vlgmr.msra.gmra.mrb[8].mxu1 %v2976_v36  ;;  %850 = vmatpush1.bf16.msra.mxu0 %v2836_v44  ;;  %v2877_v36 = vld [vmem:[%s3921_s1 + $0x1e4] ss:$8 sps:$4 sm:$0xff]   ;;  %v2878_v44 = vld [vmem:[%s3921_s1 + $0x1f0] ss:$8 sps:$4 sm:$0xff]  }
  0x54   :  { %830 = vmatprep.mubr.bf16.mxu0 %v2872_v48  ;;  %851 = vmatprep.subr.bf16.mxu0 %v2841_v51  ;;  %v2884_v48 = vld [vmem:[%s3922_s0 + $0x3c] ss:$24 sps:$4 sm:$0xff]   ;;  %v2887_v51 = vld [vmem:[%s3922_s0 + $0x6c] ss:$24 sps:$4 sm:$0xff]  }
  0x55   :  { %2505 = vmatpush3.bf16.msra.mxu1 %v3344_v12  ;;  %2508 = vmatprep.mubr.msk.bf16.mxu1 %vm2975_vm0, %v2974_v14 }
  0x56   :  { %2506 = vmatprep.subr.bf16.mxu1 %v2974_v14 }
  0x57   :  { %852 = vmatpush1.bf16.msra.mxu0 %v2839_v52 }
  0x58   :  { %853 = vmatprep.subr.bf16.mxu0 %v2844_v54 }
  0x59   :  { %2507 = vmatpush3.bf16.msra.mxu1 %v3360_v22 }
  0x5a   :  { %2512 = vmatprep.subr.bf16.mxu1 %v2974_v14  ;;  %831 = vmatmul.mubr.bf16.gmra.mrb[12].mxu0 %v2874_v56 }
  0x5b   :  { %854 = vmatpush1.bf16.msra.mxu0 %v2842_v58  ;;  %873 = vmatprep.mubr.bf16.mxu0 %v2883_v60 }
  0x5c   :  { %855 = vmatprep.subr.bf16.mxu0 %v2847_v62 }
  0x5f   :  { %856 = vmatpush1.bf16.msra.mxu0 %v2845_v0 }
  0x60   :  { %857 = vmatprep.subr.bf16.mxu0 %v2850_v4 }
  0x63   :  { %858 = vmatpush1.bf16.msra.mxu0 %v2848_v6 }
  0x64   :  { %859 = vmatprep.subr.bf16.mxu0 %v2853_v8 }
  0x67   :  { %860 = vmatpush1.bf16.msra.mxu0 %v2851_v10 }
  0x68   :  { %861 = vmatprep.subr.bf16.mxu0 %v2859_v16 }
  0x6b   :  { %862 = vmatpush1.bf16.msra.mxu0 %v2857_v18 }
  0x6c   :  { %863 = vmatprep.subr.bf16.mxu0 %v2862_v20 }
  0x6f   :  { %864 = vmatpush1.bf16.msra.mxu0 %v2860_v24 }
  0x70   :  { %865 = vmatprep.subr.bf16.mxu0 %v2868_v26 }
  0x73   :  { %866 = vmatpush1.bf16.msra.mxu0 %v2866_v28 }
  0x74   :  { %867 = vmatprep.subr.bf16.mxu0 %v2871_v32 }
  0x77   :  { %868 = vmatpush1.bf16.msra.mxu0 %v2869_v34 }
  0x78   :  { %869 = vmatprep.subr.bf16.mxu0 %v2877_v36 }
  0x7b   :  { %870 = vmatpush1.bf16.msra.mxu0 %v2875_v38 }
  0x7c   :  { %871 = vmatprep.subr.bf16.mxu0 %v2880_v42 }
  0x7f   :  { %872 = vmatpush1.bf16.msra.mxu0 %v2878_v44 }
  0x80   :  { %914 = vmatprep.subr.bf16.mxu0 %v3041_v1  ;;  %v2889_v1 = vld [vmem:[%s3922_s0 + $0x68] ss:$24 sps:$4 sm:$0xff]  }
  0x82   :  { %874 = vmatmul.mubr.bf16.vlgmr.msra.gmra.mrb[0].mxu0 %v2881_v46 }
  0x83   :  { %915 = vmatpush1.bf16.msra.mxu0 %v3049_v3  ;;  %883 = vmatprep.mubr.bf16.mxu0 %v2884_v48  ;;  %v2890_v3 = vld [vmem:[%s3922_s0 + $0x9c] ss:$24 sps:$4 sm:$0xff]  }
  0x84   :  { %916 = vmatprep.subr.bf16.mxu0 %v3059_v5  ;;  %v2892_v5 = vld [vmem:[%s3922_s0 + $0x98] ss:$24 sps:$4 sm:$0xff]  }
  0x87   :  { %917 = vmatpush1.bf16.msra.mxu0 %v3067_v7  ;;  %v2895_v7 = vld [vmem:[%s3922_s0 + $0x14] ss:$24 sps:$4 sm:$0xff]  }
  0x88   :  { %918 = vmatprep.subr.bf16.mxu0 %v3076_v9  ;;  %v2893_v9 = vld [vmem:[%s3922_s0 + $0x10] ss:$24 sps:$4 sm:$0xff]  }
  0x8a   :  { %884 = vmatmul.mubr.bf16.gmra.mrb[4].mxu0 %v2886_v49 }
  0x8b   :  { %919 = vmatpush1.bf16.msra.mxu0 %v3084_v11  ;;  %893 = vmatprep.mubr.bf16.mxu0 %v2887_v51  ;;  %v2896_v11 = vld [vmem:[%s3922_s0 + $0x44] ss:$24 sps:$4 sm:$0xff]  }
  0x8c   :  { %920 = vmatprep.subr.bf16.mxu0 %v3094_v13  ;;  %v2898_v13 = vld [vmem:[%s3922_s0 + $0x40] ss:$24 sps:$4 sm:$0xff]  }
  0x8f   :  { %921 = vmatpush1.bf16.msra.mxu0 %v3103_v15  ;;  %v2899_v15 = vld [vmem:[%s3922_s0 + $0x74] ss:$24 sps:$4 sm:$0xff]  }
  0x90   :  { %922 = vmatprep.subr.bf16.mxu0 %v3112_v17  ;;  %v2901_v17 = vld [vmem:[%s3922_s0 + $0x70] ss:$24 sps:$4 sm:$0xff]  }
  0x92   :  { %894 = vmatmul.mubr.bf16.gmra.mrb[8].mxu0 %v2889_v1 }
  0x93   :  { %923 = vmatpush1.bf16.msra.mxu0 %v3120_v19  ;;  %903 = vmatprep.mubr.bf16.mxu0 %v2890_v3  ;;  %v158_v19 = vlaneseq }
  0x94   :  { %924 = vmatprep.subr.bf16.mxu0 %v3130_v21 }
  0x95   :  { %v159_v21 = vshrl.u32 %v158_v19, 7 }
  0x97   :  { %925 = vmatpush1.bf16.msra.mxu0 %v3139_v23  ;;  %v156_v23 = vld [vmem:[%s3926_s2] sm:$0x3]  ;;  %s2978_s2 = smov 96  }
  0x98   :  { %926 = vmatprep.subr.bf16.mxu0 %v3148_v25  ;;  %v164_v25 = vsub.s32 1, %v159_v21 }
  0x9a   :  { %904 = vmatmul.mubr.bf16.gmra.mrb[12].mxu0 %v2892_v5 }
  0x9b   :  { %927 = vmatpush1.bf16.msra.mxu0 %v3156_v27  ;;  %946 = vmatprep.mubr.bf16.mxu0 %v2895_v7  ;;  %v3569_v27 = vrot.slane %v156_v23, %v164_v25 }
  0x9c   :  { %928 = vmatprep.subr.bf16.mxu0 %v3166_v29 }
  0x9f   :  { %929 = vmatpush1.bf16.msra.mxu0 %v3175_v31 }
  0xa0   :  { %930 = vmatprep.subr.bf16.mxu0 %v3184_v33 }
  0xa3   :  { %931 = vmatpush1.bf16.msra.mxu0 %v3192_v35 }
  0xa4   :  { %932 = vmatprep.subr.bf16.mxu0 %v3202_v37 }
  0xa7   :  { %933 = vmatpush1.bf16.msra.mxu0 %v3211_v39 }
  0xa8   :  { %934 = vmatprep.subr.bf16.mxu0 %v3220_v41 }
  0xab   :  { %935 = vmatpush1.bf16.msra.mxu0 %v3228_v43 }
  0xac   :  { %936 = vmatprep.subr.bf16.mxu0 %v3238_v45 }
  0xaf   :  { %937 = vmatpush1.bf16.msra.mxu0 %v3246_v47 }
  0xb0   :  { %938 = vmatprep.subr.bf16.mxu0 %v3258_v50 }
  0xb3   :  { %939 = vmatpush1.bf16.msra.mxu0 %v3271_v53  ;;  %v2407_v53 = vld [vmem:[%s3927_s5] ss:$0 sm:$0xff]  ;;  %s2979_s5 = smov 32  }
  0xb4   :  { %940 = vmatprep.subr.bf16.mxu0 %v3280_v55 }
  0xb7   :  { %941 = vmatpush1.bf16.msra.mxu0 %v3289_v57  ;;  %v160_v57 = vsub.s32 0, %v159_v21 }
  0xb8   :  { %942 = vmatprep.subr.bf16.mxu0 %v3298_v59 }
  0xb9   :  { %v161_v59 = vrot.slane %v156_v23, %v160_v57 }
  0xbb   :  { %943 = vmatpush1.bf16.msra.mxu0 %v3306_v61 }
  0xbc   :  { %944 = vmatprep.subr.bf16.mxu0 %v3316_v63 }
  0xbf   :  { %945 = vmatpush1.bf16.msra.mxu0 %v3325_v2 }
  0xc2   :  { %947 = vmatmul.mubr.bf16.vlgmr.msra.gmra.mrb[0].mxu0 %v2893_v9 }
  0xc3   :  { %956 = vmatprep.mubr.bf16.mxu0 %v2896_v11 }
  0xca   :  { %957 = vmatmul.mubr.bf16.gmra.mrb[4].mxu0 %v2898_v13 }
  0xcb   :  { %966 = vmatprep.mubr.bf16.mxu0 %v2899_v15  ;;  %v3616_v15 = vpop.permute.xlu1 %1148 }
  0xd2   :  { %967 = vmatmul.mubr.bf16.gmra.mrb[8].mxu0 %v2901_v17 }
 0x116   :  { %v978_v29 = vpop.f32.mrb[0].mxu1 }
 0x117   :  { %v980_v31 = vpop.f32.mrb[1].mxu1 }
 0x118   :  { %v982_v33 = vpop.f32.mrb[2].mxu1 }
 0x119   :  { %v984_v35 = vpop.f32.mrb[3].mxu1 }
 0x11e   :  { %v3571_v37 = vpop.f32.mrb[4].mxu1 }
 0x11f   :  { %v2494_v39 = vpop.f32.mrb[5].mxu1 }
 0x120   :  { %v1060_v41 = vpop.f32.mrb[6].mxu1 }
 0x121   :  { %v2495_v43 = vpop.f32.mrb[7].mxu1 }
 0x126   :  { %v1133_v45 = vpop.f32.mrb[8].mxu1 }
 0x127   :  { %1140 = vrot.lane.b32.xlu0 %v1133_v45, %s2977_s11  ;;  %v2502_v47 = vpop.f32.mrb[9].mxu1 }
 0x128   :  { %v1136_v50 = vpop.f32.mrb[10].mxu1 }
 0x129   :  { %v2503_v55 = vpop.f32.mrb[11].mxu1 }
 0x12b   :  { %1068 = vrot.lane.b32.xlu0 %v2407_v53, %s2977_s11 }
 0x16d   :  { %v905_v61 = vpop.f32.mrb[12].mxu0 }
 0x16e   :  { %v2676_v63 = vadd.f32 %v905_v61, %v161_v59  ;;  %v907_v2 = vpop.f32.mrb[13].mxu0 }
 0x16f   :  { %v2678_v52 = vadd.f32 %v907_v2, %v3569_v27  ;;  %v909_v54 = vpop.f32.mrb[14].mxu0 }
 0x170   :  { %v2680_v56 = vadd.f32 %v909_v54, %v161_v59  ;;  %v911_v58 = vpop.f32.mrb[15].mxu0  ;;  %v3579_v60 = vadd.f32 %v2676_v63, %v978_v29 }
 0x171   :  { %v2682_v62 = vadd.f32 %v911_v58, %v3569_v27  ;;  %v3582_v0 = vadd.f32 %v2678_v52, %v980_v31 }
 0x172   :  { %v3584_v4 = vadd.f32 %v2680_v56, %v982_v33  ;;  %v1151_v33 = vadd.f32 %v3616_v15, %v1133_v45 }
 0x173   :  { %v3586_v6 = vadd.f32 %v2682_v62, %v984_v35 }
 0x195   :  { %v948_v8 = vpop.f32.mrb[0].mxu0 }
 0x196   :  { %v3588_v10 = vadd.f32 %v948_v8, %v161_v59  ;;  %v950_v16 = vpop.f32.mrb[1].mxu0 }
 0x197   :  { %v3591_v18 = vadd.f32 %v950_v16, %v3569_v27  ;;  %v952_v20 = vpop.f32.mrb[2].mxu0 }
 0x198   :  { %v3593_v24 = vadd.f32 %v952_v20, %v161_v59  ;;  %v954_v28 = vpop.f32.mrb[3].mxu0  ;;  %v1063_v39 = vadd.f32 %v3588_v10, %v3571_v37 }
 0x199   :  { %v1141_v26 = vpop.permute.xlu0 %1140  ;;  %v3597_v34 = vadd.f32 %v954_v28, %v3569_v27 }
 0x19a   :  { %v1143_v32 = vadd.f32 %v3584_v4, %v1141_v26  ;;  %v1064_v41 = vmul.f32 0.5, %v1063_v39 }
 0x19c   :  { %v1144_v36 = vmul.f32 0.5, %v1143_v32 }
 0x19d   :  { %v3599_v38 = vpop.permute.xlu0 %1068  ;;  %v958_v42 = vpop.f32.mrb[4].mxu0 }
 0x19e   :  { %2906 = vtanh.f32 %v1144_v36  ;;  %v1071_v44 = vadd.f32 %v3599_v38, %v3571_v37  ;;  %v3603_v46 = vadd.f32 %v958_v42, %v161_v59  ;;  %v960_v48 = vpop.f32.mrb[5].mxu0 }
 0x19f   :  { %v3606_v49 = vadd.f32 %v960_v48, %v3569_v27  ;;  %v962_v51 = vpop.f32.mrb[6].mxu0  ;;  %2908 = vtanh.f32 %v1064_v41 }
 0x1a0   :  { %1073 = vrot.lane.b32.xlu1 %v1071_v44, %s2977_s11  ;;  %v3609_v1 = vadd.f32 %v962_v51, %v161_v59  ;;  %v964_v3 = vpop.f32.mrb[7].mxu0 }
 0x1a1   :  { %v3612_v5 = vadd.f32 %v964_v3, %v3569_v27 }
 0x1a5   :  { %v968_v7 = vpop.f32.mrb[8].mxu0 }
 0x1a6   :  { %v3614_v9 = vadd.f32 %v968_v7, %v161_v59  ;;  %v970_v11 = vpop.f32.mrb[9].mxu0 }
 0x1a7   :  { %v3619_v17 = vadd.f32 %v970_v11, %v3569_v27  ;;  %v972_v19 = vpop.f32.mrb[10].mxu0 }
 0x1a8   :  { %v2907_v13 = vpop.eup %2906  ;;  %v3621_v23 = vadd.f32 %v972_v19, %v161_v59  ;;  %v974_v25 = vpop.f32.mrb[11].mxu0 }
 0x1a9   :  { %v1146_v21 = vmul.f32 0.5, %v2907_v13  ;;  %v3624_v29 = vadd.f32 %v974_v25, %v3569_v27  ;;  %v2909_v43 = vpop.eup %2908 }
 0x1aa   :  { %v1066_v47 = vmul.f32 0.5, %v2909_v43 }
 0x1ab   :  { %v1147_v31 = vadd.f32 0.5, %v1146_v21 }
 0x1ac   :  { %v1067_v50 = vadd.f32 0.5, %v1066_v47 }
 0x1ad   :  { %v1152_v35 = vmul.f32 %v1151_v33, %v1147_v31  ;;  %v1159_v58 = vsub.f32 1.0, %v1147_v31  ;;  %v1165_v8 = vmul.f32 0.0, %v1147_v31 }
 0x1ae   :  { %v1079_v37 = vsub.f32 1.0, %v1067_v50  ;;  %v1085_v2 = vmul.f32 0.0, %v1067_v50 }
 0x1af   :  { %1154 = vrot.lane.b32.xlu0 %v1152_v35, %s2978_s2 }
 0x212   :  { %v1074_v53 = vpop.permute.xlu1 %1073 }
 0x213   :  { %v1076_v55 = vmul.f32 %v1074_v53, %v1067_v50 }
 0x215   :  { %v1077_v27 = vadd.f32 %v3591_v18, %v1076_v55 }
 0x217   :  { %2910 = vtanh.f32 %v1077_v27 }
 0x221   :  { %v2911_v57 = vpop.eup %2910  ;;  %v1155_v59 = vpop.permute.xlu0 %1154 }
 0x222   :  { %v1157_v45 = vadd.f32 %v3586_v6, %v1155_v59  ;;  %1081 = vrot.lane.b32.xlu1 %v2911_v57, %s2979_s5 }
 0x224   :  { %2912 = vtanh.f32 %v1157_v45 }
 0x22e   :  { %v2913_v61 = vpop.eup %2912 }
 0x22f   :  { %1161 = vrot.lane.b32.xlu0 %v2913_v61, %s2977_s11 }
 0x294   :  { %v1082_v63 = vpop.permute.xlu1 %1081 }
 0x295   :  { %v1084_v52 = vmul.f32 %v1082_v63, %v1079_v37 }
 0x297   :  { %v1086_v54 = vadd.f32 %v1085_v2, %v1084_v52 }
 0x299   :  { %v1167_v56 = vpack.c.bf16 %v1086_v54, %v1086_v54 }
 0x29b   :  { %1169 = vrot.lane.b32.xlu1 %v1167_v56, %s2978_s2 }
 0x2a1   :  { %v1162_v62 = vpop.permute.xlu0 %1161 }
 0x2a2   :  { %v1164_v16 = vmul.f32 %v1162_v62, %v1159_v58 }
 0x2a4   :  { %v3635_v20 = vadd.f32 %v1165_v8, %v1164_v16 }
 0x2a6   :  { %v1235_v26 = vpack.c.bf16 %v3635_v20, %v3635_v20 }
 0x2a8   :  { %1237 = vrot.lane.b32.xlu0 %v1235_v26, %s2979_s5 }
 0x30d   :  { %v1170_v28 = vpop.permute.xlu1 %1169 }
 0x30e   :  { %2509 = vmatmul.mubr.msk.bf16.vlgmr.msra.gmra.mrb[12].mxu1 %vm1019_vm1, %v1170_v28 }
 0x30f   :  { %2513 = vmatpush3.bf16.msra.mxu1 %v3378_v30  ;;  %2516 = vmatprep.mubr.msk.bf16.mxu1 %vm2975_vm0, %v2974_v14 }
 0x310   :  { %2514 = vmatprep.subr.bf16.mxu1 %v2974_v14 }
 0x313   :  { %2515 = vmatpush3.bf16.msra.mxu1 %v3394_v40 }
 0x314   :  { %2520 = vmatprep.subr.bf16.mxu1 %v2974_v14 }
 0x31a   :  { %v1238_v32 = vpop.permute.xlu0 %1237 }
 0x31b   :  { %2517 = vmatmul.mubr.msk.bf16.vlgmr.msra.gmra.mrb[16].mxu1 %vm1019_vm1, %v1238_v32 }
 0x31c   :  { %2521 = vmatpush3.bf16.msra.mxu1 %v3344_v12  ;;  %2524 = vmatprep.mubr.msk.bf16.mxu1 %vm2975_vm0, %v2974_v14 }
 0x31d   :  { %2522 = vmatprep.subr.bf16.mxu1 %v2974_v14 }
 0x320   :  { %2523 = vmatpush3.bf16.msra.mxu1 %v3360_v22 }
 0x321   :  { %2528 = vmatprep.subr.bf16.mxu1 %v2974_v14 }
 0x3e1   :  { %v1208_v36 = vpop.f32.mrb[12].mxu1 }
 0x3e2   :  { %v1219_v42 = vadd.f32 %v1208_v36, %v3599_v38  ;;  %v2510_v44 = vpop.f32.mrb[13].mxu1  ;;  %v1214_v19 = vadd.f32 %v3593_v24, %v1208_v36 }
 0x3e3   :  { %v1211_v48 = vpop.f32.mrb[14].mxu1 }
 0x3e4   :  { %1221 = vrot.lane.b32.xlu0 %v1219_v42, %s2977_s11  ;;  %v2511_v51 = vpop.f32.mrb[15].mxu1  ;;  %v1215_v21 = vmul.f32 0.5, %v1214_v19 }
 0x3e6   :  { %2914 = vtanh.f32 %v1215_v21 }
 0x3ee   :  { %v1276_v3 = vpop.f32.mrb[16].mxu1 }
 0x3ef   :  { %1283 = vrot.lane.b32.xlu1 %v1276_v3, %s2977_s11  ;;  %v2518_v7 = vpop.f32.mrb[17].mxu1  ;;  %v1291_v57 = vadd.f32 %v1276_v3, %v3616_v15 }
 0x3f0   :  { %v1279_v11 = vpop.f32.mrb[18].mxu1  ;;  %v2915_v25 = vpop.eup %2914 }
 0x3f1   :  { %v2519_v13 = vpop.f32.mrb[19].mxu1  ;;  %v1217_v31 = vmul.f32 0.5, %v2915_v25 }
 0x3f3   :  { %v1218_v33 = vadd.f32 0.5, %v1217_v31 }
 0x3f5   :  { %v1227_v61 = vsub.f32 1.0, %v1218_v33  ;;  %v1233_v63 = vmul.f32 %v1218_v33, %v1086_v54 }
 0x456   :  { %v1222_v35 = vpop.permute.xlu0 %1221 }
 0x457   :  { %v1224_v39 = vmul.f32 %v1222_v35, %v1218_v33 }
 0x459   :  { %v1225_v41 = vadd.f32 %v3597_v34, %v1224_v39 }
 0x45b   :  { %2916 = vtanh.f32 %v1225_v41 }
 0x461   :  { %v1284_v43 = vpop.permute.xlu1 %1283 }
 0x462   :  { %v1286_v47 = vadd.f32 %v3579_v60, %v1284_v43 }
 0x464   :  { %v1287_v50 = vmul.f32 0.5, %v1286_v47 }
 0x465   :  { %v2917_v53 = vpop.eup %2916 }
 0x466   :  { %2918 = vtanh.f32 %v1287_v50  ;;  %1229 = vrot.lane.b32.xlu0 %v2917_v53, %s2979_s5 }
 0x470   :  { %v2919_v55 = vpop.eup %2918 }
 0x471   :  { %v1289_v27 = vmul.f32 0.5, %v2919_v55 }
 0x473   :  { %v1290_v59 = vadd.f32 0.5, %v1289_v27 }
 0x475   :  { %v1292_v45 = vmul.f32 %v1291_v57, %v1290_v59  ;;  %v1299_v54 = vsub.f32 1.0, %v1290_v59  ;;  %v1305_v28 = vmul.f32 %v1290_v59, %v3635_v20 }
 0x477   :  { %1294 = vrot.lane.b32.xlu1 %v1292_v45, %s2978_s2 }
 0x4d8   :  { %v1230_v37 = vpop.permute.xlu0 %1229 }
 0x4d9   :  { %v1232_v2 = vmul.f32 %v1230_v37, %v1227_v61 }
 0x4db   :  { %v1234_v52 = vadd.f32 %v1233_v63, %v1232_v2 }
 0x4dd   :  { %v1307_v56 = vpack.c.bf16 %v1234_v52, %v1234_v52 }
 0x4df   :  { %1309 = vrot.lane.b32.xlu0 %v1307_v56, %s2978_s2 }
 0x4e9   :  { %v1295_v58 = vpop.permute.xlu1 %1294 }
 0x4ea   :  { %v1297_v62 = vadd.f32 %v3582_v0, %v1295_v58 }
 0x4ec   :  { %2920 = vtanh.f32 %v1297_v62 }
 0x4f6   :  { %v2921_v8 = vpop.eup %2920 }
 0x4f7   :  { %1301 = vrot.lane.b32.xlu1 %v2921_v8, %s2977_s11 }
 0x551   :  { %v1310_v16 = vpop.permute.xlu0 %1309 }
 0x552   :  { %2525 = vmatmul.mubr.msk.bf16.vlgmr.msra.gmra.mrb[20].mxu1 %vm1019_vm1, %v1310_v16 }
 0x553   :  { %2529 = vmatpush3.bf16.msra.mxu1 %v3378_v30  ;;  %2532 = vmatprep.mubr.msk.bf16.mxu1 %vm2975_vm0, %v2974_v14 }
 0x554   :  { %2530 = vmatprep.subr.bf16.mxu1 %v2974_v14 }
 0x557   :  { %2531 = vmatpush3.bf16.msra.mxu1 %v3394_v40 }
 0x558   :  { %2536 = vmatprep.subr.bf16.mxu1 %v2974_v14 }
 0x569   :  { %v1302_v26 = vpop.permute.xlu1 %1301 }
 0x56a   :  { %v1304_v32 = vmul.f32 %v1302_v26, %v1299_v54 }
 0x56c   :  { %v3674_v36 = vadd.f32 %v1305_v28, %v1304_v32 }
 0x56e   :  { %v1375_v42 = vpack.c.bf16 %v3674_v36, %v3674_v36 }
 0x570   :  { %1377 = vrot.lane.b32.xlu1 %v1375_v42, %s2979_s5 }
 0x5e2   :  { %v1378_v44 = vpop.permute.xlu1 %1377 }
 0x5e3   :  { %2533 = vmatmul.mubr.msk.bf16.vlgmr.msra.gmra.mrb[24].mxu1 %vm1019_vm1, %v1378_v44 }
 0x5e4   :  { %2537 = vmatpush3.bf16.msra.mxu1 %v3344_v12  ;;  %2540 = vmatprep.mubr.msk.bf16.mxu1 %vm2975_vm0, %v2974_v14 }
 0x5e5   :  { %2538 = vmatprep.subr.bf16.mxu1 %v2974_v14 }
 0x5e8   :  { %2539 = vmatpush3.bf16.msra.mxu1 %v3360_v22 }
 0x5e9   :  { %2544 = vmatprep.subr.bf16.mxu1 %v2974_v14 }
 0x625   :  { %v1348_v20 = vpop.f32.mrb[20].mxu1 }
 0x626   :  { %v1359_v48 = vadd.f32 %v1348_v20, %v3599_v38  ;;  %v2526_v51 = vpop.f32.mrb[21].mxu1  ;;  %v1354_v11 = vadd.f32 %v3603_v46, %v1348_v20 }
 0x627   :  { %v1351_v3 = vpop.f32.mrb[22].mxu1 }
 0x628   :  { %1361 = vrot.lane.b32.xlu1 %v1359_v48, %s2977_s11  ;;  %v2527_v7 = vpop.f32.mrb[23].mxu1  ;;  %v1355_v13 = vmul.f32 0.5, %v1354_v11 }
 0x62a   :  { %2922 = vtanh.f32 %v1355_v13 }
 0x634   :  { %v2923_v19 = vpop.eup %2922 }
 0x635   :  { %v1357_v21 = vmul.f32 0.5, %v2923_v19 }
 0x637   :  { %v1358_v25 = vadd.f32 0.5, %v1357_v21 }
 0x639   :  { %v1367_v53 = vsub.f32 1.0, %v1358_v25  ;;  %v1373_v27 = vmul.f32 %v1358_v25, %v1234_v52 }
 0x69a   :  { %v1362_v31 = vpop.permute.xlu1 %1361 }
 0x69b   :  { %v1364_v33 = vmul.f32 %v1362_v31, %v1358_v25 }
 0x69d   :  { %v1365_v35 = vadd.f32 %v3606_v49, %v1364_v33 }
 0x69f   :  { %2924 = vtanh.f32 %v1365_v35 }
 0x6a9   :  { %v2925_v39 = vpop.eup %2924 }
 0x6aa   :  { %1369 = vrot.lane.b32.xlu1 %v2925_v39, %s2979_s5 }
 0x6b6   :  { %v1416_v41 = vpop.f32.mrb[24].mxu1 }
 0x6b7   :  { %1423 = vrot.lane.b32.xlu0 %v1416_v41, %s2977_s11  ;;  %v2534_v43 = vpop.f32.mrb[25].mxu1  ;;  %v1431_v58 = vadd.f32 %v1416_v41, %v3616_v15 }
 0x6b8   :  { %v1419_v47 = vpop.f32.mrb[26].mxu1 }
 0x6b9   :  { %v2535_v50 = vpop.f32.mrb[27].mxu1 }
 0x71c   :  { %v1370_v55 = vpop.permute.xlu1 %1369 }
 0x71d   :  { %v1372_v57 = vmul.f32 %v1370_v55, %v1367_v53 }
 0x71f   :  { %v1374_v59 = vadd.f32 %v1373_v27, %v1372_v57 }
 0x721   :  { %v1447_v45 = vpack.c.bf16 %v1374_v59, %v1374_v59 }
 0x723   :  { %1449 = vrot.lane.b32.xlu1 %v1447_v45, %s2978_s2 }
 0x729   :  { %v1424_v61 = vpop.permute.xlu0 %1423 }
 0x72a   :  { %v1426_v37 = vadd.f32 %v3621_v23, %v1424_v61 }
 0x72c   :  { %v1427_v63 = vmul.f32 0.5, %v1426_v37 }
 0x72e   :  { %2926 = vtanh.f32 %v1427_v63 }
 0x738   :  { %v2927_v2 = vpop.eup %2926 }
 0x739   :  { %v1429_v56 = vmul.f32 0.5, %v2927_v2 }
 0x73b   :  { %v1430_v62 = vadd.f32 0.5, %v1429_v56 }
 0x73d   :  { %v1432_v8 = vmul.f32 %v1431_v58, %v1430_v62  ;;  %v1439_v28 = vsub.f32 1.0, %v1430_v62  ;;  %v1445_v42 = vmul.f32 %v1430_v62, %v3674_v36 }
 0x73f   :  { %1434 = vrot.lane.b32.xlu0 %v1432_v8, %s2978_s2 }
 0x795   :  { %v1450_v16 = vpop.permute.xlu1 %1449 }
 0x796   :  { %2541 = vmatmul.mubr.msk.bf16.vlgmr.msra.gmra.mrb[28].mxu1 %vm1019_vm1, %v1450_v16 }
 0x797   :  { %2545 = vmatpush3.bf16.msra.mxu1 %v3378_v30  ;;  %2548 = vmatprep.mubr.msk.bf16.mxu1 %vm2975_vm0, %v2974_v14 }
 0x798   :  { %2546 = vmatprep.subr.bf16.mxu1 %v2974_v14 }
 0x79b   :  { %2547 = vmatpush3.bf16.msra.mxu1 %v3394_v40 }
 0x79c   :  { %2552 = vmatprep.subr.bf16.mxu1 %v2974_v14 }
 0x7b1   :  { %v1435_v52 = vpop.permute.xlu0 %1434 }
 0x7b2   :  { %v1437_v54 = vadd.f32 %v3624_v29, %v1435_v52 }
 0x7b4   :  { %2928 = vtanh.f32 %v1437_v54 }
 0x7be   :  { %v2929_v26 = vpop.eup %2928 }
 0x7bf   :  { %1441 = vrot.lane.b32.xlu0 %v2929_v26, %s2977_s11 }
 0x831   :  { %v1442_v32 = vpop.permute.xlu0 %1441 }
 0x832   :  { %v1444_v44 = vmul.f32 %v1442_v32, %v1439_v28 }
 0x834   :  { %v3706_v20 = vadd.f32 %v1445_v42, %v1444_v44 }
 0x836   :  { %v1515_v48 = vpack.c.bf16 %v3706_v20, %v3706_v20 }
 0x838   :  { %1517 = vrot.lane.b32.xlu0 %v1515_v48, %s2979_s5 }
 0x869   :  { %v1488_v51 = vpop.f32.mrb[28].mxu1 }
 0x86a   :  { %v1499_v3 = vadd.f32 %v1488_v51, %v3599_v38  ;;  %v2542_v7 = vpop.f32.mrb[29].mxu1  ;;  %v1494_v36 = vadd.f32 %v3609_v1, %v1488_v51 }
 0x86b   :  { %v1491_v11 = vpop.f32.mrb[30].mxu1 }
 0x86c   :  { %1501 = vrot.lane.b32.xlu0 %v1499_v3, %s2977_s11  ;;  %v2543_v13 = vpop.f32.mrb[31].mxu1  ;;  %v1495_v21 = vmul.f32 0.5, %v1494_v36 }
 0x86e   :  { %2930 = vtanh.f32 %v1495_v21 }
 0x878   :  { %v2931_v25 = vpop.eup %2930 }
 0x879   :  { %v1497_v31 = vmul.f32 0.5, %v2931_v25 }
 0x87b   :  { %v1498_v33 = vadd.f32 0.5, %v1497_v31 }
 0x87d   :  { %v1507_v43 = vsub.f32 1.0, %v1498_v33  ;;  %v1513_v50 = vmul.f32 %v1498_v33, %v1374_v59 }
 0x8aa   :  { %v1518_v19 = vpop.permute.xlu0 %1517 }
 0x8ab   :  { %2549 = vmatmul.mubr.msk.bf16.vlgmr.msra.gmra.mrb[32].mxu1 %vm1019_vm1, %v1518_v19 }
 0x8ac   :  { %2553 = vmatpush3.bf16.msra.mxu1 %v3344_v12  ;;  %2556 = vmatprep.mubr.msk.bf16.mxu1 %vm2975_vm0, %v2974_v14 }
 0x8ad   :  { %2554 = vmatprep.subr.bf16.mxu1 %v2974_v14 }
 0x8b0   :  { %2555 = vmatpush3.bf16.msra.mxu1 %v3360_v22 }
 0x8b1   :  { %2560 = vmatprep.subr.bf16.mxu1 %v2974_v14 }
 0x8de   :  { %v1502_v35 = vpop.permute.xlu0 %1501 }
 0x8df   :  { %v1504_v39 = vmul.f32 %v1502_v35, %v1498_v33 }
 0x8e1   :  { %v1505_v12 = vadd.f32 %v3612_v5, %v1504_v39 }
 0x8e3   :  { %2932 = vtanh.f32 %v1505_v12 }
 0x8ed   :  { %v2933_v41 = vpop.eup %2932 }
 0x8ee   :  { %1509 = vrot.lane.b32.xlu0 %v2933_v41, %s2979_s5 }
 0x960   :  { %v1510_v47 = vpop.permute.xlu0 %1509 }
 0x961   :  { %v1512_v53 = vmul.f32 %v1510_v47, %v1507_v43 }
 0x963   :  { %v3723_v55 = vadd.f32 %v1513_v50, %v1512_v53 }
 0x965   :  { %v1587_v27 = vpack.c.bf16 %v3723_v55, %v3723_v55 }
 0x967   :  { %1589 = vrot.lane.b32.xlu0 %v1587_v27, %s2978_s2 }
 0x97e   :  { %v1556_v57 = vpop.f32.mrb[32].mxu1 }
 0x97f   :  { %1563 = vrot.lane.b32.xlu1 %v1556_v57, %s2977_s11  ;;  %v2550_v45 = vpop.f32.mrb[33].mxu1  ;;  %v1571_v8 = vadd.f32 %v1556_v57, %v3616_v15 }
 0x980   :  { %v1559_v61 = vpop.f32.mrb[34].mxu1 }
 0x981   :  { %v2551_v37 = vpop.f32.mrb[35].mxu1 }
 0x9d9   :  { %v1590_v63 = vpop.permute.xlu0 %1589 }
 0x9da   :  { %2557 = vmatmul.mubr.msk.bf16.vlgmr.msra.gmra.mrb[36].mxu1 %vm1019_vm1, %v1590_v63 }
 0x9db   :  { %2561 = vmatpush3.bf16.msra.mxu1 %v3378_v30  ;;  %2564 = vmatprep.mubr.msk.bf16.mxu1 %vm2975_vm0, %v2974_v14 }
 0x9dc   :  { %2562 = vmatprep.subr.bf16.mxu1 %v2974_v14 }
 0x9df   :  { %2563 = vmatpush3.bf16.msra.mxu1 %v3394_v40 }
 0x9e0   :  { %2568 = vmatprep.subr.bf16.mxu1 %v2974_v14 }
 0x9f1   :  { %v1564_v59 = vpop.permute.xlu1 %1563 }
 0x9f2   :  { %v1566_v2 = vadd.f32 %v3614_v9, %v1564_v59 }
 0x9f4   :  { %v1567_v56 = vmul.f32 0.5, %v1566_v2 }
 0x9f6   :  { %2934 = vtanh.f32 %v1567_v56 }
 0xa00   :  { %v2935_v58 = vpop.eup %2934 }
 0xa01   :  { %v1569_v62 = vmul.f32 0.5, %v2935_v58 }
 0xa03   :  { %v1570_v16 = vadd.f32 0.5, %v1569_v62 }
 0xa05   :  { %v1572_v30 = vmul.f32 %v1571_v8, %v1570_v16  ;;  %v1579_v48 = vsub.f32 1.0, %v1570_v16  ;;  %v1585_v3 = vmul.f32 %v1570_v16, %v3706_v20  ;;  %v3754_v20 = vld [vmem:[%s3923_s3] sm:$0xff]  }
 0xa07   :  { %1574 = vrot.lane.b32.xlu1 %v1572_v30, %s2978_s2 }
 0xa79   :  { %v1575_v52 = vpop.permute.xlu1 %1574 }
 0xa7a   :  { %v1577_v54 = vadd.f32 %v3619_v17, %v1575_v52 }
 0xa7c   :  { %2936 = vtanh.f32 %v1577_v54 }
 0xa86   :  { %v2937_v26 = vpop.eup %2936 }
 0xa87   :  { %1581 = vrot.lane.b32.xlu1 %v2937_v26, %s2977_s11 }
 0xaad   :  { %v1628_v28 = vpop.f32.mrb[36].mxu1 }
 0xaae   :  { %v2558_v32 = vpop.f32.mrb[37].mxu1  ;;  %v1639_v19 = vadd.f32 %v1628_v28, %v3599_v38  ;;  %v1634_v36 = vadd.f32 %v3614_v9, %v1628_v28 }
 0xaaf   :  { %v1631_v42 = vpop.f32.mrb[38].mxu1 }
 0xab0   :  { %v2559_v44 = vpop.f32.mrb[39].mxu1  ;;  %v1635_v21 = vmul.f32 0.5, %v1634_v36 }
 0xab2   :  { %2938 = vtanh.f32 %v1635_v21 }
 0xabc   :  { %v2939_v25 = vpop.eup %2938 }
 0xabd   :  { %v1637_v31 = vmul.f32 0.5, %v2939_v25 }
 0xabf   :  { %v1638_v35 = vadd.f32 0.5, %v1637_v31 }
 0xac1   :  { %v1647_v43 = vsub.f32 1.0, %v1638_v35  ;;  %v1653_v50 = vmul.f32 %v1638_v35, %v3723_v55  ;;  %v3775_v55 = vld [vmem:[%s3924_s4] sm:$0xff]  }
 0xaf9   :  { %v1582_v51 = vpop.permute.xlu1 %1581 }
 0xafa   :  { %v1584_v7 = vmul.f32 %v1582_v51, %v1579_v48 }
 0xafc   :  { %v3742_v11 = vadd.f32 %v1585_v3, %v1584_v7 }
 0xafe   :  { %v1655_v13 = vpack.c.bf16 %v3742_v11, %v3742_v11 }
 0xb00   :  { %1657 = vrot.lane.b32.xlu1 %v1655_v13, %s2979_s5 }
 0xb04   :  { %1641 = vrot.lane.b32.xlu1 %v1639_v19, %s2977_s11 }
 0xb72   :  { %v1658_v33 = vpop.permute.xlu1 %1657 }
 0xb73   :  { %2565 = vmatmul.mubr.msk.bf16.vlgmr.msra.gmra.mrb[40].mxu1 %vm1019_vm1, %v1658_v33 }
 0xb74   :  { %2569 = vmatpush3.bf16.msra.mxu1 %v3754_v20  ;;  %2572 = vmatprep.mubr.msk.bf16.mxu1 %vm2975_vm0, %v2974_v14 }
 0xb75   :  { %2570 = vmatprep.subr.bf16.mxu1 %v2974_v14 }
 0xb76   :  { %v1642_v9 = vpop.permute.xlu1 %1641 }
 0xb77   :  { %v1644_v39 = vmul.f32 %v1642_v9, %v1638_v35 }
 0xb78   :  { %2571 = vmatpush3.bf16.msra.mxu1 %v3360_v22 }
 0xb79   :  { %v1645_v12 = vadd.f32 %v3619_v17, %v1644_v39  ;;  %2576 = vmatprep.subr.bf16.mxu1 %v2974_v14 }
 0xb7b   :  { %2940 = vtanh.f32 %v1645_v12 }
 0xb85   :  { %v2941_v41 = vpop.eup %2940 }
 0xb86   :  { %1649 = vrot.lane.b32.xlu1 %v2941_v41, %s2979_s5 }
 0xbf8   :  { %v1650_v47 = vpop.permute.xlu1 %1649 }
 0xbf9   :  { %v1652_v53 = vmul.f32 %v1650_v47, %v1647_v43 }
 0xbfb   :  { %v3765_v27 = vadd.f32 %v1653_v50, %v1652_v53 }
 0xbfd   :  { %v1727_v57 = vpack.c.bf16 %v3765_v27, %v3765_v27 }
 0xbff   :  { %1729 = vrot.lane.b32.xlu1 %v1727_v57, %s2978_s2 }
 0xc46   :  { %v1696_v22 = vpop.f32.mrb[40].mxu1 }
 0xc47   :  { %1703 = vrot.lane.b32.xlu0 %v1696_v22, %s2977_s11  ;;  %v2566_v17 = vpop.f32.mrb[41].mxu1  ;;  %v1711_v62 = vadd.f32 %v1696_v22, %v3616_v15 }
 0xc48   :  { %v1699_v45 = vpop.f32.mrb[42].mxu1 }
 0xc49   :  { %v2567_v61 = vpop.f32.mrb[43].mxu1 }
 0xc71   :  { %v1730_v37 = vpop.permute.xlu1 %1729 }
 0xc72   :  { %2573 = vmatmul.mubr.msk.bf16.vlgmr.msra.gmra.mrb[44].mxu1 %vm1019_vm1, %v1730_v37 }
 0xc73   :  { %2577 = vmatpush3.bf16.msra.mxu1 %v3775_v55  ;;  %2580 = vmatprep.mubr.msk.bf16.mxu1 %vm2975_vm0, %v2974_v14 }
 0xc74   :  { %2578 = vmatprep.subr.bf16.mxu1 %v2974_v14 }
 0xc77   :  { %2579 = vmatpush3.bf16.msra.mxu1 %v3394_v40 }
 0xc78   :  { %2584 = vmatprep.subr.bf16.mxu1 %v2974_v14 }
 0xcb9   :  { %v1704_v63 = vpop.permute.xlu0 %1703 }
 0xcba   :  { %v1706_v59 = vadd.f32 %v3609_v1, %v1704_v63 }
 0xcbc   :  { %v1707_v2 = vmul.f32 0.5, %v1706_v59 }
 0xcbe   :  { %2942 = vtanh.f32 %v1707_v2 }
 0xcc8   :  { %v2943_v56 = vpop.eup %2942 }
 0xcc9   :  { %v1709_v58 = vmul.f32 0.5, %v2943_v56 }
 0xccb   :  { %v1710_v8 = vadd.f32 0.5, %v1709_v58 }
 0xccd   :  { %v1712_v16 = vmul.f32 %v1711_v62, %v1710_v8  ;;  %v1719_v1 = vsub.f32 1.0, %v1710_v8  ;;  %v1725_v44 = vmul.f32 %v1710_v8, %v3742_v11 }
 0xccf   :  { %1714 = vrot.lane.b32.xlu0 %v1712_v16, %s2978_s2 }
 0xd41   :  { %v1715_v30 = vpop.permute.xlu0 %1714 }
 0xd42   :  { %v1717_v52 = vadd.f32 %v3612_v5, %v1715_v30 }
 0xd44   :  { %2944 = vtanh.f32 %v1717_v52 }
 0xd45   :  { %v1768_v40 = vpop.f32.mrb[44].mxu1 }
 0xd46   :  { %v2574_v54 = vpop.f32.mrb[45].mxu1  ;;  %v1779_v5 = vadd.f32 %v1768_v40, %v3599_v38  ;;  %v1774_v7 = vadd.f32 %v3621_v23, %v1768_v40  ;;  %v3805_v23 = vld [vmem:[%s3923_s3 + $0x8] sm:$0xff]  }
 0xd47   :  { %v1771_v26 = vpop.f32.mrb[46].mxu1 }
 0xd48   :  { %v2575_v28 = vpop.f32.mrb[47].mxu1  ;;  %v1775_v13 = vmul.f32 0.5, %v1774_v7 }
 0xd4a   :  { %2946 = vtanh.f32 %v1775_v13 }
 0xd4e   :  { %v2945_v32 = vpop.eup %2944 }
 0xd4f   :  { %1721 = vrot.lane.b32.xlu0 %v2945_v32, %s2977_s11 }
 0xd54   :  { %v2947_v19 = vpop.eup %2946 }
 0xd55   :  { %v1777_v36 = vmul.f32 0.5, %v2947_v19 }
 0xd57   :  { %v1778_v11 = vadd.f32 0.5, %v1777_v36 }
 0xd59   :  { %v1787_v9 = vsub.f32 1.0, %v1778_v11  ;;  %v1793_v12 = vmul.f32 %v1778_v11, %v3765_v27  ;;  %v3826_v27 = vld [vmem:[%s3924_s4 + $0x8] sm:$0xff]  }
 0xdc1   :  { %v1722_v42 = vpop.permute.xlu0 %1721 }
 0xdc2   :  { %v1724_v48 = vmul.f32 %v1722_v42, %v1719_v1 }
 0xdc4   :  { %v3789_v51 = vadd.f32 %v1725_v44, %v1724_v48 }
 0xdc6   :  { %v1795_v3 = vpack.c.bf16 %v3789_v51, %v3789_v51 }
 0xdc8   :  { %1797 = vrot.lane.b32.xlu0 %v1795_v3, %s2979_s5 }
 0xdcc   :  { %1781 = vrot.lane.b32.xlu0 %v1779_v5, %s2977_s11 }
 0xe3a   :  { %v1798_v21 = vpop.permute.xlu0 %1797 }
 0xe3b   :  { %2581 = vmatmul.mubr.msk.bf16.vlgmr.msra.gmra.mrb[48].mxu1 %vm1019_vm1, %v1798_v21 }
 0xe3c   :  { %2585 = vmatpush3.bf16.msra.mxu1 %v3754_v20  ;;  %2588 = vmatprep.mubr.msk.bf16.mxu1 %vm2975_vm0, %v2974_v14 }
 0xe3d   :  { %2586 = vmatprep.subr.bf16.mxu1 %v2974_v14 }
 0xe3e   :  { %v1782_v25 = vpop.permute.xlu0 %1781 }
 0xe3f   :  { %v1784_v31 = vmul.f32 %v1782_v25, %v1778_v11 }
 0xe40   :  { %2587 = vmatpush3.bf16.msra.mxu1 %v3805_v23 }
 0xe41   :  { %v1785_v33 = vadd.f32 %v3624_v29, %v1784_v31  ;;  %2592 = vmatprep.subr.bf16.mxu1 %v2974_v14 }
 0xe43   :  { %2948 = vtanh.f32 %v1785_v33 }
 0xe4d   :  { %v2949_v35 = vpop.eup %2948 }
 0xe4e   :  { %1789 = vrot.lane.b32.xlu0 %v2949_v35, %s2979_s5 }
 0xec0   :  { %v1790_v39 = vpop.permute.xlu0 %1789 }
 0xec1   :  { %v1792_v41 = vmul.f32 %v1790_v39, %v1787_v9 }
 0xec3   :  { %v3812_v43 = vadd.f32 %v1793_v12, %v1792_v41 }
 0xec5   :  { %v1867_v47 = vpack.c.bf16 %v3812_v43, %v3812_v43 }
 0xec7   :  { %1869 = vrot.lane.b32.xlu0 %v1867_v47, %s2978_s2 }
 0xf0e   :  { %v1836_v50 = vpop.f32.mrb[48].mxu1 }
 0xf0f   :  { %1843 = vrot.lane.b32.xlu1 %v1836_v50, %s2977_s11  ;;  %v2582_v29 = vpop.f32.mrb[49].mxu1  ;;  %v1851_v59 = vadd.f32 %v1836_v50, %v3616_v15 }
 0xf10   :  { %v1839_v53 = vpop.f32.mrb[50].mxu1 }
 0xf11   :  { %v2583_v57 = vpop.f32.mrb[51].mxu1 }
 0xf39   :  { %v1870_v22 = vpop.permute.xlu0 %1869 }
 0xf3a   :  { %2589 = vmatmul.mubr.msk.bf16.vlgmr.msra.gmra.mrb[52].mxu1 %vm1019_vm1, %v1870_v22 }
 0xf3b   :  { %2593 = vmatpush3.bf16.msra.mxu1 %v3775_v55  ;;  %2596 = vmatprep.mubr.msk.bf16.mxu1 %vm2975_vm0, %v2974_v14 }
 0xf3c   :  { %2594 = vmatprep.subr.bf16.mxu1 %v2974_v14 }
 0xf3f   :  { %2595 = vmatpush3.bf16.msra.mxu1 %v3826_v27 }
 0xf40   :  { %2600 = vmatprep.subr.bf16.mxu1 %v2974_v14 }
 0xf81   :  { %v1844_v17 = vpop.permute.xlu1 %1843 }
 0xf82   :  { %v1846_v45 = vadd.f32 %v3603_v46, %v1844_v17 }
 0xf84   :  { %v1847_v61 = vmul.f32 0.5, %v1846_v45 }
 0xf86   :  { %2950 = vtanh.f32 %v1847_v61 }
 0xf90   :  { %v2951_v37 = vpop.eup %2950 }
 0xf91   :  { %v1849_v63 = vmul.f32 0.5, %v2951_v37 }
 0xf93   :  { %v1850_v2 = vadd.f32 0.5, %v1849_v63 }
 0xf95   :  { %v1852_v56 = vmul.f32 %v1851_v59, %v1850_v2  ;;  %v1859_v46 = vsub.f32 1.0, %v1850_v2  ;;  %v1865_v26 = vmul.f32 %v1850_v2, %v3789_v51 }
 0xf97   :  { %1854 = vrot.lane.b32.xlu1 %v1852_v56, %s2978_s2 }
0x1009   :  { %v1855_v58 = vpop.permute.xlu1 %1854 }
0x100a   :  { %v1857_v62 = vadd.f32 %v3606_v49, %v1855_v58 }
0x100c   :  { %2952 = vtanh.f32 %v1857_v62 }
0x100d   :  { %v1908_v8 = vpop.f32.mrb[52].mxu1 }
0x100e   :  { %v2590_v16 = vpop.f32.mrb[53].mxu1  ;;  %v1919_v49 = vadd.f32 %v1908_v8, %v3599_v38  ;;  %v1914_v42 = vadd.f32 %v3579_v60, %v1908_v8 }
0x100f   :  { %v1911_v30 = vpop.f32.mrb[54].mxu1 }
0x1010   :  { %v2591_v52 = vpop.f32.mrb[55].mxu1  ;;  %v1915_v44 = vmul.f32 0.5, %v1914_v42 }
0x1012   :  { %2954 = vtanh.f32 %v1915_v44 }
0x1016   :  { %v2953_v40 = vpop.eup %2952 }
0x1017   :  { %1861 = vrot.lane.b32.xlu1 %v2953_v40, %s2977_s11 }
0x101c   :  { %v2955_v48 = vpop.eup %2954 }
0x101d   :  { %v1917_v3 = vmul.f32 0.5, %v2955_v48 }
0x101f   :  { %v1918_v51 = vadd.f32 0.5, %v1917_v3 }
0x1021   :  { %v1927_v36 = vsub.f32 1.0, %v1918_v51  ;;  %v1933_v21 = vmul.f32 %v1918_v51, %v3812_v43 }
0x1089   :  { %v1862_v54 = vpop.permute.xlu1 %1861 }
0x108a   :  { %v1864_v28 = vmul.f32 %v1862_v54, %v1859_v46 }
0x108c   :  { %v3836_v32 = vadd.f32 %v1865_v26, %v1864_v28  ;;  %v2903_v26 = vld [vmem:[%s3928_s8 + $0x8] sm:$0xff]  }
0x108e   :  { %v1935_v1 = vpack.c.bf16 %v3836_v32, %v3836_v32 }
0x1090   :  { %1937 = vrot.lane.b32.xlu1 %v1935_v1, %s2979_s5 }
0x1094   :  { %1921 = vrot.lane.b32.xlu1 %v1919_v49, %s2977_s11 }
0x1102   :  { %v1938_v5 = vpop.permute.xlu1 %1937 }
0x1103   :  { %2597 = vmatmul.mubr.msk.bf16.vlgmr.msra.gmra.mrb[56].mxu1 %vm1019_vm1, %v1938_v5 }
0x1104   :  { %2601 = vmatpush3.bf16.msra.mxu1 %v3754_v20  ;;  %2604 = vmatprep.mubr.msk.bf16.mxu1 %vm2975_vm0, %v2974_v14 }
0x1105   :  { %2602 = vmatprep.subr.bf16.mxu1 %v2974_v14 }
0x1106   :  { %v1922_v7 = vpop.permute.xlu1 %1921 }
0x1107   :  { %v1924_v13 = vmul.f32 %v1922_v7, %v1918_v51 }
0x1108   :  { %2603 = vmatpush3.bf16.msra.mxu1 %v3805_v23 }
0x1109   :  { %v1925_v60 = vadd.f32 %v3582_v0, %v1924_v13  ;;  %2608 = vmatprep.subr.bf16.mxu1 %v2974_v14 }
0x110b   :  { %2956 = vtanh.f32 %v1925_v60 }
0x1115   :  { %v2957_v19 = vpop.eup %2956 }
0x1116   :  { %1929 = vrot.lane.b32.xlu1 %v2957_v19, %s2979_s5 }
0x1188   :  { %v1930_v20 = vpop.permute.xlu1 %1929 }
0x1189   :  { %v1932_v11 = vmul.f32 %v1930_v20, %v1927_v36 }
0x118b   :  { %v3854_v25 = vadd.f32 %v1933_v21, %v1932_v11 }
0x118d   :  { %v2007_v31 = vpack.c.bf16 %v3854_v25, %v3854_v25 }
0x118f   :  { %2009 = vrot.lane.b32.xlu1 %v2007_v31, %s2978_s2 }
0x11d6   :  { %v1976_v23 = vpop.f32.mrb[56].mxu1 }
0x11d7   :  { %1983 = vrot.lane.b32.xlu0 %v1976_v23, %s2977_s11  ;;  %v2598_v0 = vpop.f32.mrb[57].mxu1  ;;  %v1991_v50 = vadd.f32 %v1976_v23, %v3616_v15 }
0x11d8   :  { %v1979_v33 = vpop.f32.mrb[58].mxu1 }
0x11d9   :  { %v2599_v35 = vpop.f32.mrb[59].mxu1 }
0x1201   :  { %v2010_v9 = vpop.permute.xlu1 %2009 }
0x1202   :  { %2605 = vmatmul.mubr.msk.bf16.vlgmr.msra.gmra.mrb[60].mxu1 %vm1019_vm1, %v2010_v9 }
0x1203   :  { %2609 = vmatpush3.bf16.msra.mxu1 %v3775_v55  ;;  %2612 = vmatprep.mubr.msk.bf16.mxu1 %vm2975_vm0, %v2974_v14 }
0x1204   :  { %2610 = vmatprep.subr.bf16.mxu1 %v2974_v14 }
0x1207   :  { %2611 = vmatpush3.bf16.msra.mxu1 %v3826_v27 }
0x1208   :  { %2616 = vmatprep.subr.bf16.mxu1 %v2974_v14 }
0x1249   :  { %v1984_v39 = vpop.permute.xlu0 %1983 }
0x124a   :  { %v1986_v12 = vadd.f32 %v3593_v24, %v1984_v39 }
0x124c   :  { %v1987_v41 = vmul.f32 0.5, %v1986_v12 }
0x124e   :  { %2958 = vtanh.f32 %v1987_v41 }
0x1258   :  { %v2959_v43 = vpop.eup %2958 }
0x1259   :  { %v1989_v47 = vmul.f32 0.5, %v2959_v43 }
0x125b   :  { %v1990_v29 = vadd.f32 0.5, %v1989_v47 }
0x125d   :  { %v1992_v55 = vmul.f32 %v1991_v50, %v1990_v29  ;;  %v1999_v24 = vsub.f32 1.0, %v1990_v29  ;;  %v2005_v63 = vmul.f32 %v1990_v29, %v3836_v32 }
0x125f   :  { %1994 = vrot.lane.b32.xlu0 %v1992_v55, %s2978_s2 }
0x12d1   :  { %v1995_v53 = vpop.permute.xlu0 %1994 }
0x12d2   :  { %v1997_v57 = vadd.f32 %v3597_v34, %v1995_v53 }
0x12d4   :  { %2960 = vtanh.f32 %v1997_v57 }
0x12d5   :  { %v2048_v22 = vpop.f32.mrb[60].mxu1 }
0x12d6   :  { %v2606_v27 = vpop.f32.mrb[61].mxu1  ;;  %v2059_v34 = vadd.f32 %v2048_v22, %v3599_v38  ;;  %v2054_v58 = vadd.f32 %v3584_v4, %v2048_v22  ;;  %v2902_v4 = vld [vmem:[%s3928_s8] sm:$0xff]  }
0x12d7   :  { %v2051_v17 = vpop.f32.mrb[62].mxu1 }
0x12d8   :  { %v2607_v45 = vpop.f32.mrb[63].mxu1  ;;  %v2055_v62 = vmul.f32 0.5, %v2054_v58 }
0x12da   :  { %2962 = vtanh.f32 %v2055_v62 }
0x12de   :  { %v2961_v61 = vpop.eup %2960 }
0x12df   :  { %2001 = vrot.lane.b32.xlu0 %v2961_v61, %s2977_s11 }
0x12e4   :  { %v2963_v8 = vpop.eup %2962 }
0x12e5   :  { %v2057_v16 = vmul.f32 0.5, %v2963_v8 }
0x12e7   :  { %v2058_v52 = vadd.f32 0.5, %v2057_v16 }
0x12e9   :  { %v2067_v28 = vsub.f32 1.0, %v2058_v52  ;;  %v2073_v32 = vmul.f32 %v2058_v52, %v3854_v25 }
0x1351   :  { %v2002_v37 = vpop.permute.xlu0 %2001 }
0x1352   :  { %v2004_v59 = vmul.f32 %v2002_v37, %v1999_v24 }
0x1354   :  { %v3873_v2 = vadd.f32 %v2005_v63, %v2004_v59 }
0x1356   :  { %v2075_v56 = vpack.c.bf16 %v3873_v2, %v3873_v2 }
0x1358   :  { %2077 = vrot.lane.b32.xlu0 %v2075_v56, %s2979_s5 }
0x135c   :  { %2061 = vrot.lane.b32.xlu0 %v2059_v34, %s2977_s11 }
0x13ca   :  { %v2078_v30 = vpop.permute.xlu0 %2077 }
0x13cb   :  { %2613 = vmatmul.mubr.msk.bf16.vlgmr.msra.gmra.mrb[64].mxu1 %vm1019_vm1, %v2078_v30 }
0x13cc   :  { %2620 = vmatprep.mubr.msk.bf16.mxu1 %vm2975_vm0, %v2974_v14  ;;  %2617 = vmatpush3.bf16.msra.mxu1 %v2902_v4 }
0x13cd   :  { %2618 = vmatprep.subr.bf16.mxu1 %v2974_v14 }
0x13ce   :  { %v2062_v40 = vpop.permute.xlu0 %2061 }
0x13cf   :  { %v2064_v46 = vmul.f32 %v2062_v40, %v2058_v52 }
0x13d0   :  { %2619 = vmatpush3.bf16.msra.mxu1 %v2903_v26 }
0x13d1   :  { %v2065_v54 = vadd.f32 %v3586_v6, %v2064_v46  ;;  %2624 = vmatprep.subr.bf16.mxu1 %v2974_v14 }
0x13d3   :  { %2964 = vtanh.f32 %v2065_v54 }
0x13dd   :  { %v2965_v38 = vpop.eup %2964 }
0x13de   :  { %2069 = vrot.lane.b32.xlu0 %v2965_v38, %s2979_s5 }
0x1450   :  { %v2070_v6 = vpop.permute.xlu0 %2069 }
0x1451   :  { %v2072_v1 = vmul.f32 %v2070_v6, %v2067_v28 }
0x1453   :  { %v2074_v49 = vadd.f32 %v2073_v32, %v2072_v1 }
0x1455   :  { %v2152_v42 = vpack.c.bf16 %v2074_v49, %v2074_v49 }
0x1457   :  { %2158 = vrot.lane.b32.xlu0 %v2152_v42, %s2978_s2 }
0x149e   :  { %v2116_v44 = vpop.f32.mrb[64].mxu1 }
0x149f   :  { %2123 = vrot.lane.b32.xlu1 %v2116_v44, %s2977_s11  ;;  %v2614_v48 = vpop.f32.mrb[65].mxu1  ;;  %v2131_v20 = vadd.f32 %v2116_v44, %v3616_v15  ;;  %v2905_v15 = vld [vmem:[%s3929_s7 + $0x8] sm:$0xff]  }
0x14a0   :  { %v2119_v3 = vpop.f32.mrb[66].mxu1 }
0x14a1   :  { %v2615_v5 = vpop.f32.mrb[67].mxu1 }
0x14c9   :  { %v2159_v51 = vpop.permute.xlu0 %2158 }
0x14ca   :  { %2621 = vmatmul.mubr.msk.bf16.vlgmr.msra.gmra.mrb[68].mxu1 %vm1019_vm1, %v2159_v51 }
0x14cb   :  { %2628 = vmatprep.mubr.msk.bf16.mxu1 %vm2975_vm0, %v2974_v14 }
0x1511   :  { %v2124_v7 = vpop.permute.xlu1 %2123 }
0x1512   :  { %v2126_v13 = vadd.f32 %v3588_v10, %v2124_v7  ;;  %v2904_v10 = vld [vmem:[%s3929_s7] sm:$0xff]  }
0x1513   :  { %2625 = vmatpush3.bf16.msra.mxu1 %v2904_v10 }
0x1514   :  { %v2127_v60 = vmul.f32 0.5, %v2126_v13  ;;  %2626 = vmatprep.subr.bf16.mxu1 %v2974_v14  ;;  %v2433_v14 = vld [vmem:[%s3930_s9] ss:$0 sm:$0xff] }
0x1516   :  { %2966 = vtanh.f32 %v2127_v60 }
0x1517   :  { %2627 = vmatpush3.bf16.msra.mxu1 %v2905_v15 }
0x1520   :  { %v2967_v19 = vpop.eup %2966 }
0x1521   :  { %v2129_v36 = vmul.f32 0.5, %v2967_v19 }
0x1523   :  { %v2130_v21 = vadd.f32 0.5, %v2129_v36 }
0x1525   :  { %v2132_v11 = vmul.f32 %v2131_v20, %v2130_v21  ;;  %v2145_v12 = vmul.f32 %v2130_v21, %v3873_v2 }
0x1527   :  { %2134 = vrot.lane.b32.xlu1 %v2132_v11, %s2978_s2 }
0x1599   :  { %v2135_v25 = vpop.permute.xlu1 %2134 }
0x159a   :  { %v2137_v31 = vadd.f32 %v3591_v18, %v2135_v25  ;;  %v2139_v18 = vsub.f32 1.0, %v2130_v21 }
0x159c   :  { %2968 = vtanh.f32 %v2137_v31 }
0x159d   :  { %v2209_v23 = vpop.f32.mrb[68].mxu1 }
0x159e   :  { %v2622_v0 = vpop.f32.mrb[69].mxu1 }
0x159f   :  { %v2212_v33 = vpop.f32.mrb[70].mxu1 }
0x15a0   :  { %v2623_v35 = vpop.f32.mrb[71].mxu1 }
0x15a6   :  { %v2969_v9 = vpop.eup %2968 }
0x15a7   :  { %2141 = vrot.lane.b32.xlu1 %v2969_v9, %s2977_s11 }
0x1619   :  { %v2142_v39 = vpop.permute.xlu1 %2141 }
0x161a   :  { %v2144_v41 = vmul.f32 %v2142_v39, %v2139_v18 }
0x161c   :  { %v2146_v43 = vadd.f32 %v2145_v12, %v2144_v41 }
0x161e   :  { %v2147_v47 = vpack.c.bf16 %v2146_v43, %v2146_v43 }
0x1620   :  { %2216 = vrot.lane.b32.xlu1 %v2147_v47, %s2979_s5 }
0x1692   :  { %v2217_v50 = vpop.permute.xlu1 %2216 }
0x1693   :  { %2629 = vmatmul.mubr.msk.bf16.vlgmr.msra.gmra.mrb[72].mxu1 %vm1019_vm1, %v2217_v50 }
0x1766   :  { %v2267_v29 = vpop.f32.mrb[72].mxu1 }
0x1767   :  { %v2268_v55 = vadd.f32 %v2267_v29, %v2209_v23  ;;  %v2630_v53 = vpop.f32.mrb[73].mxu1 }
0x1768   :  { %v2270_v57 = vpop.f32.mrb[74].mxu1 }
0x1769   :  { %v2280_v22 = vadd.f32 %v2433_v14, %v2268_v55  ;;  %v2631_v27 = vpop.f32.mrb[75].mxu1 }
0x176b   :  { %2282 = vst.msk [vmem:[%s3931_s10] sm:$0xff] %vm2281_vm2, %v2280_v22 }

</bundles_post_ra>
